<compile_context>
chip_gen: v5e
topology: v5e:2x2
jax: 0.10.0
libtpu: 0.0.40
codegen_flags: <defaults>
</compile_context>

<pallas_src>
import functools
import math

import jax
import jax.numpy as jnp
from jax.experimental import pallas as pl
from jax.experimental.pallas import tpu as pltpu

BN_SCALE = 1.0 / math.sqrt(1.0 + 1e-5)   # eval-mode BN with default running stats
NEG_SLOPE = 0.2
VMEM_LIMIT = 64 * 1024 * 1024


def _round_up(x, m):
    return ((x + m - 1) // m) * m


def _pick_row_tile(m, max_tile=1024):
    # Largest tile <= max_tile that divides M (no row-pad copy); fall back to a small tile + pad.
    for t in (1024, 512, 256, 128, 64, 32, 16, 8):
        if t <= max_tile and m % t == 0:
            return t
    return 8 if m < 128 else 128


# ----------------------------------------------------------------------------- #
# Pallas kernel 1: bf16 matmul with fused LeakyReLU epilogue (BN folded into weights).
# a: (M, K) bf16, b: (K, cout) bf16 -> (M, cout) bf16, f32 accumulation on the MXU.
# Output channel dim is the TRUE cout (full-extent block; no pad/unpad round trip).
# ----------------------------------------------------------------------------- #
def _mm_kernel(a_ref, b_ref, o_ref, *, act, neg):
    acc = jnp.dot(a_ref[...], b_ref[...], preferred_element_type=jnp.float32)
    if act:
        acc = jnp.where(acc >= 0, acc, neg * acc)
    o_ref[...] = acc.astype(o_ref.dtype)


def pallas_matmul(a, b, act=True, neg=NEG_SLOPE, out_dtype=jnp.bfloat16):
    M, K = a.shape
    cout = int(b.shape[1])
    tm = _pick_row_tile(M)
    Mp = _round_up(M, tm)
    a_p = a if Mp == M else jnp.pad(a, ((0, Mp - M), (0, 0)))

    out = pl.pallas_call(
        functools.partial(_mm_kernel, act=act, neg=neg),
        out_shape=jax.ShapeDtypeStruct((Mp, cout), out_dtype),
        grid_spec=pltpu.PrefetchScalarGridSpec(
            num_scalar_prefetch=0,
            grid=(Mp // tm,),
            in_specs=[
                pl.BlockSpec((tm, K), lambda i: (i, 0)),
                pl.BlockSpec((K, cout), lambda i: (0, 0)),
            ],
            out_specs=pl.BlockSpec((tm, cout), lambda i: (i, 0)),
        ),
        compiler_params=pltpu.CompilerParams(
            dimension_semantics=("parallel",), vmem_limit_bytes=VMEM_LIMIT),
    )(a_p, b)
    return out if Mp == M else out[:M]


# ----------------------------------------------------------------------------- #
# Pallas kernel 2: conv3d with the depth-tap reduction fused in-kernel.
# Patches P: (N, D+2, rows, K2p) hold only the 9 in-plane taps (b,c,cin); the 3 depth taps are
# accumulated over a trailing "arbitrary" grid axis with block index (stride*d + a) and an f32
# VMEM accumulator; LeakyReLU + bf16 store happen on the last tap.
# ----------------------------------------------------------------------------- #
def _conv3d_kernel(p_ref, w_ref, o_ref, acc_ref, *, act, neg):
    a = pl.program_id(3)

    @pl.when(a == 0)
    def _init():
        acc_ref[...] = jnp.zeros_like(acc_ref)

    acc_ref[...] += jnp.dot(p_ref[0, 0], w_ref[0],
                            preferred_element_type=jnp.float32)

    @pl.when(a == pl.num_programs(3) - 1)
    def _finish():
        r = acc_ref[...]
        if act:
            r = jnp.where(r >= 0, r, neg * r)
        o_ref[0, 0] = r.astype(o_ref.dtype)


def conv3d(x, wmat3, stride=1, act=True):
    # x: (N, D, H, W, cin);  wmat3: (3, K2p, cout) bf16 prepared (rows ordered (kh, kw, cin)).
    K2p, cout = int(wmat3.shape[1]), int(wmat3.shape[2])
    N, D, H, W, cin = x.shape
    xb = x.astype(jnp.bfloat16)
    xp = jnp.pad(xb, ((0, 0), (1, 1), (1, 1), (1, 1), (0, 0)))
    Dp = D + 2
    OD = (D - 1) // stride + 1
    OH = (H - 1) // stride + 1
    OW = (W - 1) // stride + 1

    cols = [
        xp[:, :, b:b + stride * (OH - 1) + 1:stride,
                 c:c + stride * (OW - 1) + 1:stride, :]
        for b in range(3) for c in range(3)
    ]
    K2 = 9 * cin
    if K2p != K2:
        cols.append(jnp.zeros((N, Dp, OH, OW, K2p - K2), jnp.bfloat16))
    P = jnp.concatenate(cols, axis=-1).reshape(N, Dp, OH * OW, K2p)

    rows = OH * OW
    TR = _pick_row_tile(rows)
    Rp = _round_up(rows, TR)
    if Rp != rows:
        P = jnp.pad(P, ((0, 0), (0, 0), (0, Rp - rows), (0, 0)))

    out = pl.pallas_call(
        functools.partial(_conv3d_kernel, act=act, neg=NEG_SLOPE),
        out_shape=jax.ShapeDtypeStruct((N, OD, Rp, cout), jnp.bfloat16),
        grid_spec=pltpu.PrefetchScalarGridSpec(
            num_scalar_prefetch=0,
            grid=(N, OD, Rp // TR, 3),
            in_specs=[
                pl.BlockSpec((1, 1, TR, K2p),
                             lambda n, d, r, a, s=stride: (n, s * d + a, r, 0)),
                pl.BlockSpec((1, K2p, cout), lambda n, d, r, a: (a, 0, 0)),
            ],
            out_specs=pl.BlockSpec((1, 1, TR, cout),
                                   lambda n, d, r, a: (n, d, r, 0)),
            scratch_shapes=[pltpu.VMEM((TR, cout), jnp.float32)],
        ),
        compiler_params=pltpu.CompilerParams(
            dimension_semantics=("parallel", "parallel", "parallel", "arbitrary"),
            vmem_limit_bytes=VMEM_LIMIT),
    )(P, wmat3)
    if Rp != rows:
        out = out[:, :, :rows, :]
    return out.reshape(N, OD, OH, OW, cout)


# ----------------------------------------------------------------------------- #
# conv2d: bf16 im2col (9/25 taps) + single Pallas matmul with fused LeakyReLU.
# ----------------------------------------------------------------------------- #
def conv2d(x, pw, stride=1, act=True):
    wm, k = pw["wm"], pw["k"]
    Kp, cout = int(wm.shape[0]), int(wm.shape[1])
    ph = k // 2
    N, H, W, cin = x.shape
    xb = x.astype(jnp.bfloat16)
    xp = jnp.pad(xb, ((0, 0), (ph, ph), (ph, ph), (0, 0)))
    OH = (H + 2 * ph - k) // stride + 1
    OW = (W + 2 * ph - k) // stride + 1
    cols = [
        xp[:, i:i + stride * (OH - 1) + 1:stride,
              j:j + stride * (OW - 1) + 1:stride, :]
        for i in range(k) for j in range(k)
    ]
    Kraw = k * k * cin
    if Kp != Kraw:
        cols.append(jnp.zeros((N, OH, OW, Kp - Kraw), jnp.bfloat16))
    patches = jnp.concatenate(cols, axis=-1).reshape(N * OH * OW, Kp)
    y = pallas_matmul(patches, wm, act=act)
    return y.reshape(N, OH, OW, cout)


# ----------------------------------------------------------------------------- #
# deconv3d (ConvTranspose3d k=3, s=2, p=1, output_padding=1): all 8 sub-pixel phases merged
# into one matmul with a block-sparse (8*cin, 8*cout) weight, then a single interleave transpose.
# ----------------------------------------------------------------------------- #
_PHASE_TAPS = {0: ((1, 0),), 1: ((0, 0), (2, 1))}   # parity -> (flipped-kernel idx, input offset)


def deconv3d(x, Bmat, act=True):
    # x: (N, D, H, W, cin);  Bmat: (8*cin, 8*cout) bf16 prepared.
    N, D, H, W, cin = x.shape
    cout = int(Bmat.shape[1]) // 8
    xe = jnp.pad(x.astype(jnp.bfloat16), ((0, 0), (0, 1), (0, 1), (0, 1), (0, 0)))
    cols = [
        xe[:, oa:oa + D, ob:ob + H, oc:oc + W, :]
        for oa in (0, 1) for ob in (0, 1) for oc in (0, 1)
    ]
    A = jnp.concatenate(cols, axis=-1).reshape(N * D * H * W, 8 * cin)
    y = pallas_matmul(A, Bmat, act=act)                       # (M, 8*cout)
    y = y.reshape(N, D, H, W, 2, 2, 2, cout)
    # TODO(synk): the phase interleave is one XLA transpose; direct strided/phase-offset output
    #             index maps would remove this last full-volume shuffle.
    y = jnp.transpose(y, (0, 1, 4, 2, 5, 3, 6, 7)).reshape(N, 2 * D, 2 * H, 2 * W, cout)
    return y


# ----------------------------------------------------------------------------- #
# Pallas kernel 3: variance cost-volume fusion. Key features are passed ONCE and stay
# VMEM-resident across the S axis (index_map ignores s); cost volumes are bf16 in/out with f32
# in-register accumulation.
# ----------------------------------------------------------------------------- #
def _var_kernel(key_ref, *rest):
    o_ref = rest[-1]
    xs = [key_ref[0].astype(jnp.float32)] + [r[0, 0].astype(jnp.float32) for r in rest[:-1]]
    v = float(len(xs))
    mean = xs[0]
    for x in xs[1:]:
        mean = mean + x
    mean = mean * (1.0 / v)
    acc = (xs[0] - mean) * (xs[0] - mean)
    for x in xs[1:]:
        acc = acc + (x - mean) * (x - mean)
    o_ref[0, 0] = (acc * (1.0 / v)).astype(o_ref.dtype)


def _pick_h_tile(Hf, L, cap_bytes=4 << 20):
    if Hf % 8 != 0:
        return Hf                       # full-extent block fallback
    best = 8
    for t in range(8, Hf + 1, 8):
        if Hf % t == 0 and t * L * 2 <= cap_bytes:
            best = t
    return best


def variance_fusion(feat_key, corrs):
    # feat_key: (N, Hf, Wf, C) bf16;  corrs: list of (N, S, Hf, Wf, C) bf16
    N, Hf, Wf, C = feat_key.shape
    S = corrs[0].shape[1]
    L = Wf * C
    key2 = feat_key.astype(jnp.bfloat16).reshape(N, Hf, L)
    corr2 = [c.astype(jnp.bfloat16).reshape(N, S, Hf, L) for c in corrs]
    TH = _pick_h_tile(Hf, L)

    out = pl.pallas_call(
        _var_kernel,
        out_shape=jax.ShapeDtypeStruct((N, S, Hf, L), jnp.bfloat16),
        grid_spec=pltpu.PrefetchScalarGridSpec(
            num_scalar_prefetch=0,
            grid=(N, Hf // TH, S),
            in_specs=[pl.BlockSpec((1, TH, L), lambda n, h, s: (n, h, 0))]
                     + [pl.BlockSpec((1, 1, TH, L), lambda n, h, s: (n, s, h, 0))
                        for _ in corr2],
            out_specs=pl.BlockSpec((1, 1, TH, L), lambda n, h, s: (n, s, h, 0)),
        ),
        compiler_params=pltpu.CompilerParams(
            dimension_semantics=("parallel", "parallel", "parallel"),
            vmem_limit_bytes=VMEM_LIMIT),
    )(key2, *corr2)
    # TODO(synk): warp validity masks are not folded into the variance (rmvd may weight by masks).
    return out.reshape(N, S, Hf, Wf, C)


# ----------------------------------------------------------------------------- #
# Pallas kernel 4: softmax over depth planes + (inv)depth expectation + uncertainty.
# Lane-dense layout: score/invd are (S, M) with M on the 128-lane axis, softmax over sublanes.
# ----------------------------------------------------------------------------- #
def _reg_kernel(score_ref, invd_ref, inv_o, dep_o, unc_o):
    s = score_ref[...]                                   # (Sp, TC)
    m = jnp.max(s, axis=0, keepdims=True)
    e = jnp.exp(s - m)
    p = e / jnp.sum(e, axis=0, keepdims=True)
    inv = jnp.sum(p * invd_ref[...], axis=0, keepdims=True)
    inv_o[...] = inv
    dep_o[...] = 1.0 / inv
    # TODO(synk): original MVSNet confidence uses a 4-neighbour prob sum around argmax;
    #             surrogate uncertainty = 1 - max probability.
    unc_o[...] = 1.0 - jnp.max(p, axis=0, keepdims=True)


def depth_regression(score, sampling_invdepths):
    # score: (N, S, Hf, Wf);  sampling_invdepths: (N, S)
    N, S, Hf, Wf = score.shape
    M = N * Hf * Wf
    s2 = jnp.transpose(score, (1, 0, 2, 3)).reshape(S, M).astype(jnp.float32)
    invd = jnp.broadcast_to(
        jnp.transpose(sampling_invdepths).astype(jnp.float32)[:, :, None],
        (S, N, Hf * Wf),
    ).reshape(S, M)

    Sp = _round_up(S, 8)
    TC = min(2048, _round_up(M, 128))
    Mp = _round_up(M, TC)
    if Sp != S:
        s2 = jnp.pad(s2, ((0, Sp - S), (0, 0)), constant_values=-1e30)
        invd = jnp.pad(invd, ((0, Sp - S), (0, 0)))
    if Mp != M:
        s2 = jnp.pad(s2, ((0, 0), (0, Mp - M)))
        invd = jnp.pad(invd, ((0, 0), (0, Mp - M)), constant_values=1.0)

    outs = pl.pallas_call(
        _reg_kernel,
        out_shape=(jax.ShapeDtypeStruct((1, Mp), jnp.float32),) * 3,
        grid_spec=pltpu.PrefetchScalarGridSpec(
            num_scalar_prefetch=0,
            grid=(Mp // TC,),
            in_specs=[
                pl.BlockSpec((Sp, TC), lambda i: (0, i)),
                pl.BlockSpec((Sp, TC), lambda i: (0, i)),
            ],
            out_specs=(
                pl.BlockSpec((1, TC), lambda i: (0, i)),
                pl.BlockSpec((1, TC), lambda i: (0, i)),
                pl.BlockSpec((1, TC), lambda i: (0, i)),
            ),
        ),
        compiler_params=pltpu.CompilerParams(
            dimension_semantics=("parallel",), vmem_limit_bytes=VMEM_LIMIT),
    )(s2, invd)
    invdepth, depth, unc = [
        o[0, :M].reshape(N, Hf, Wf)[:, None] for o in outs
    ]  # (N, 1, Hf, Wf)
    return invdepth, depth, unc


# ----------------------------------------------------------------------------- #
# Plane-sweep warping of source features to the key view (glue).
# TODO(synk): bilinear grid-sample warp kept in plain JAX (data-dependent gather;
#             no clean BlockSpec expression on TPU).
# ----------------------------------------------------------------------------- #
def planesweep_warp(feat_src, K_key_f, K_src_f, T_src_to_key, depths):
    feat_src = feat_src.astype(jnp.float32)
    N, Hf, Wf, C = feat_src.shape
    T_k2s = jnp.linalg.inv(T_src_to_key)
    R = T_k2s[:, :3, :3]
    t = T_k2s[:, :3, 3]
    ys, xs = jnp.meshgrid(jnp.arange(Hf, dtype=jnp.float32),
                          jnp.arange(Wf, dtype=jnp.float32), indexing="ij")
    pix = jnp.stack([xs.ravel(), ys.ravel(), jnp.ones(Hf * Wf, jnp.float32)], axis=0)  # (3, P)
    rays = jnp.einsum("nij,jp->nip", jnp.linalg.inv(K_key_f), pix)                     # (N, 3, P)
    pts = depths[:, :, None, None] * rays[:, None, :, :]                               # (N, S, 3, P)
    pts_src = jnp.einsum("nij,nsjp->nsip", R, pts) + t[:, None, :, None]
    proj = jnp.einsum("nij,nsjp->nsip", K_src_f, pts_src)
    eps = 1e-6
    z = proj[:, :, 2]
    u = proj[:, :, 0] / jnp.maximum(z, eps)
    v = proj[:, :, 1] / jnp.maximum(z, eps)
    valid = (z > eps) & (u >= 0) & (u <= Wf - 1) & (v >= 0) & (v <= Hf - 1)

    def sample_one(feat, uu, vv, vd):
        x0 = jnp.floor(uu)
        y0 = jnp.floor(vv)
        wx = uu - x0
        wy = vv - y0
        x0i = jnp.clip(x0.astype(jnp.int32), 0, Wf - 1)
        x1i = jnp.clip(x0i + 1, 0, Wf - 1)
        y0i = jnp.clip(y0.astype(jnp.int32), 0, Hf - 1)
        y1i = jnp.clip(y0i + 1, 0, Hf - 1)
        g = lambda yy, xx: feat[yy, xx]  # (S, P, C)
        out = (((1 - wx) * (1 - wy))[..., None] * g(y0i, x0i)
               + (wx * (1 - wy))[..., None] * g(y0i, x1i)
               + ((1 - wx) * wy)[..., None] * g(y1i, x0i)
               + (wx * wy)[..., None] * g(y1i, x1i))
        return out * vd[..., None].astype(out.dtype)

    warped = jax.vmap(sample_one)(feat_src, u, v, valid)       # (N, S, P, C)
    S = depths.shape[1]
    warped = warped.reshape(N, S, Hf, Wf, C).astype(jnp.bfloat16)   # bf16 cost-volume stream
    mask = valid.reshape(N, S, Hf, Wf, 1).astype(jnp.float32)
    return warped, mask


# ----------------------------------------------------------------------------- #
# Parameters: deterministic kaiming_normal(a=0.2) init (as init_weights), then prepare_params
# folds BN scale, bf16 cast, K padding and the (tap, K, cout) reshape once, outside the forward.
# ----------------------------------------------------------------------------- #
def _kaiming(key, shape, fan_in, a=0.2):
    gain = math.sqrt(2.0 / (1.0 + a * a))
    std = gain / math.sqrt(fan_in)
    return std * jax.random.normal(key, shape, jnp.float32)


def init_params(seed=0):
    keys = iter(jax.random.split(jax.random.PRNGKey(seed), 256))
    p = {}

    enc = {}
    for name, k, cin, cout in [("conv0", 3, 3, 8), ("conv1", 3, 8, 8),
                               ("conv2", 5, 8, 16), ("conv3", 3, 16, 16),
                               ("conv4", 3, 16, 16), ("conv5", 5, 16, 32),
                               ("conv6", 3, 32, 32), ("conv7", 3, 32, 32)]:
        enc[name] = _kaiming(next(keys), (k, k, cin, cout), cin * k * k)
    p["encoder"] = enc

    def enc3d_params(cin0):
        d = {}
        for name, ci, co in [("c0", cin0, 8), ("c1", 8, 16), ("c2", 16, 16),
                             ("c3", 16, 32), ("c4", 32, 32), ("c5", 32, 64),
                             ("c6", 64, 64)]:
            d[name] = _kaiming(next(keys), (3, 3, 3, ci, co), ci * 27)
        return d

    def dec3d_params():
        d = {}
        for name, ci, co in [("d7", 64, 32), ("d8", 32, 16), ("d9", 16, 8),
                             ("conv11", 8, 8), ("prob", 8, 1)]:
            d[name] = _kaiming(next(keys), (3, 3, 3, ci, co), ci * 27)
        return d

    p["hg1_enc"], p["hg1_dec"] = enc3d_params(32), dec3d_params()
    p["hg2_enc"], p["hg2_dec"] = enc3d_params(8), dec3d_params()
    # hourglass3 is constructed in the reference module but never used in forward().
    p["hg3_enc"], p["hg3_dec"] = enc3d_params(8), dec3d_params()
    return p


def _prep_conv2d(w, bn=True):
    k, _, cin, cout = (int(s) for s in w.shape)
    K = k * k * cin
    Kp = _round_up(K, 128)
    wm = (w * BN_SCALE if bn else w).reshape(K, cout)
    if Kp != K:
        wm = jnp.pad(wm, ((0, Kp - K), (0, 0)))
    return {"wm": wm.astype(jnp.bfloat16), "k": k}


def _prep_conv3d(w, bn=True):
    cin, cout = int(w.shape[3]), int(w.shape[4])
    K2 = 9 * cin
    K2p = _round_up(K2, 128)
    wm = (w * BN_SCALE if bn else w).reshape(3, K2, cout)
    if K2p != K2:
        wm = jnp.pad(wm, ((0, 0), (0, K2p - K2), (0, 0)))
    return wm.astype(jnp.bfloat16)


def _prep_deconv3d(w, bn=True):
    # Weight convention (k,k,k,cin,cout), self-consistent with init_params (not PyTorch's
    # (cin,cout,k,k,k) checkpoint layout).  # TODO(synk): verify against dense ConvTranspose3d.
    cin, cout = int(w.shape[3]), int(w.shape[4])
    wf = w[::-1, ::-1, ::-1]
    if bn:
        wf = wf * BN_SCALE
    B = jnp.zeros((8 * cin, 8 * cout), jnp.float32)
    p_idx = 0
    for pd in (0, 1):
        for ph in (0, 1):
            for pw in (0, 1):
                for a, oa in _PHASE_TAPS[pd]:
                    for b, ob in _PHASE_TAPS[ph]:
                        for c, oc in _PHASE_TAPS[pw]:
                            t = oa * 4 + ob * 2 + oc
                            B = B.at[t * cin:(t + 1) * cin,
                                     p_idx * cout:(p_idx + 1) * cout].set(wf[a, b, c])
                p_idx += 1
    return B.astype(jnp.bfloat16)


def prepare_params(p):
    q = {"encoder": {name: _prep_conv2d(w, bn=(name != "conv7"))
                     for name, w in p["encoder"].items()}}

    def prep_enc3d(d):
        return {k: _prep_conv3d(w, bn=True) for k, w in d.items()}

    def prep_dec3d(d):
        out = {}
        for k, w in d.items():
            if k.startswith("d"):
                out[k] = _prep_deconv3d(w, bn=True)
            else:                       # conv11, prob: no BN, no activation
                out[k] = _prep_conv3d(w, bn=False)
        return out

    for key in ("hg1_enc", "hg2_enc", "hg3_enc"):
        q[key] = prep_enc3d(p[key])
    for key in ("hg1_dec", "hg2_dec", "hg3_dec"):
        q[key] = prep_dec3d(p[key])
    return q


# ----------------------------------------------------------------------------- #
# Network blocks.
# ----------------------------------------------------------------------------- #
def encoder2d(p, x):
    c0 = conv2d(x, p["conv0"])
    c1 = conv2d(c0, p["conv1"])
    c2 = conv2d(c1, p["conv2"], stride=2)
    c3 = conv2d(c2, p["conv3"])
    c4 = conv2d(c3, p["conv4"])
    c5 = conv2d(c4, p["conv5"], stride=2)
    c6 = conv2d(c5, p["conv6"])
    c7 = conv2d(c6, p["conv7"], act=False)
    return {"conv1": c1, "conv4": c4, "conv7": c7}, c7


def enc3d(p, x):
    c0 = conv3d(x, p["c0"])
    c1 = conv3d(c0, p["c1"], stride=2)
    c2 = conv3d(c1, p["c2"])
    c3 = conv3d(c2, p["c3"], stride=2)
    c4 = conv3d(c3, p["c4"])
    c5 = conv3d(c4, p["c5"], stride=2)
    c6 = conv3d(c5, p["c6"])
    return {"conv0": c0, "conv2": c2, "conv4": c4}, c6


def dec3d(p, enc, all_enc, sampling_invdepths):
    x = deconv3d(enc, p["d7"]) + all_enc["conv4"]
    x = deconv3d(x, p["d8"]) + all_enc["conv2"]
    x = deconv3d(x, p["d9"]) + all_enc["conv0"]
    conv11 = conv3d(x, p["conv11"], act=False)                     # (N, S, H, W, 8)
    score = conv3d(conv11, p["prob"], act=False)[..., 0]           # (N, S, H, W)
    invdepth, depth, unc = depth_regression(score, sampling_invdepths)
    return {"3d_conv11": conv11, "scores": score,
            "depth": depth, "invdepth": invdepth, "uncertainty": unc}


# ----------------------------------------------------------------------------- #
# Full forward pass.
# ----------------------------------------------------------------------------- #
def mvsnet_forward(params, images, poses, intrinsics, keyview_idx,
                   depth_range=None, num_sampling_points=8):
    # TODO(synk): int() concretizes keyview_idx at trace time; a traced key index would need a
    #             gather-based view selection.
    ki = int(keyview_idx[0])
    image_key = images[ki]
    images_source = [im for i, im in enumerate(images) if i != ki]
    intr_key = intrinsics[ki]
    intr_sources = [x for i, x in enumerate(intrinsics) if i != ki]
    src2key = [x for i, x in enumerate(poses) if i != ki]

    N = image_key.shape[0]
    if depth_range is None:
        min_depth = jnp.full((N,), 0.2, jnp.float32)
        max_depth = jnp.full((N,), 100.0, jnp.float32)
    else:
        min_depth, max_depth = depth_range

    to_nhwc = lambda t: jnp.transpose(t, (0, 2, 3, 1))

    _, enc_key = encoder2d(params["encoder"], to_nhwc(image_key))
    enc_sources = [encoder2d(params["encoder"], to_nhwc(im))[1] for im in images_source]

    # plane-sweep sampling ('linear_depth')
    S = num_sampling_points
    steps = jnp.arange(S, dtype=jnp.float32) / (S - 1)
    depths = min_depth[:, None] + (max_depth - min_depth)[:, None] * steps[None]
    sampling_invdepths = 1.0 / depths                              # (N, S)

    Himg, Wimg = image_key.shape[2], image_key.shape[3]
    Hf, Wf = enc_key.shape[1], enc_key.shape[2]

    def scale_K(K):
        Sm = jnp.diag(jnp.array([Wf / Wimg, Hf / Himg, 1.0], jnp.float32))
        return jnp.einsum("ij,njk->nik", Sm, K)

    K_key_f = scale_K(intr_key)
    corrs, masks = [], []
    for feat_s, K_s, T in zip(enc_sources, intr_sources, src2key):
        w, m = planesweep_warp(feat_s, K_key_f, scale_K(K_s), T, depths)
        corrs.append(w)
        masks.append(m)

    fused_corr = variance_fusion(enc_key, corrs)                   # (N, S, Hf, Wf, 32) bf16

    def run_hourglass(enc_p, dec_p, vol):
        all_enc, enc = enc3d(enc_p, vol)
        return dec3d(dec_p, enc, all_enc, sampling_invdepths)

    dec_1 = run_hourglass(params["hg1_enc"], params["hg1_dec"], fused_corr)
    out_1 = dec_1["3d_conv11"]          # permute(0,2,1,3,4) is a no-op in channel-last layout
    dec_2 = run_hourglass(params["hg2_enc"], params["hg2_dec"], out_1)
    out_2 = dec_2["3d_conv11"]
    # reference forward reuses hourglass2 for the third pass (hourglass3 stays unused)
    dec_3 = run_hourglass(params["hg2_enc"], params["hg2_dec"], out_2)

    pred = {"depth": dec_3["depth"],
            "depth_uncertainty": dec_3["uncertainty"],
            "invdepth": dec_3["invdepth"]}
    aux = dict(dec_3)
    aux["depths_all"] = [dec_1["depth"], dec_2["depth"], dec_3["depth"]]
    aux["depth_uncertainties_all"] = [dec_1["uncertainty"], dec_2["uncertainty"], dec_3["uncertainty"]]
    aux["invdepths_all"] = [dec_1["invdepth"], dec_2["invdepth"], dec_3["invdepth"]]
    return pred, aux


if __name__ == "__main__":
    key = jax.random.PRNGKey(0)
    raw_params = init_params(0)
    params = prepare_params(raw_params)     # BN fold + bf16 + padding + reshape, done once

    N, H, W = 1, 32, 32         # image size multiple of 32 (features /4, 3D UNet /8)
    k1, k2 = jax.random.split(key)
    images = [jax.random.normal(k1, (N, 3, H, W), jnp.float32),
              jax.random.normal(k2, (N, 3, H, W), jnp.float32)]
    K = jnp.array([[[35.0, 0.0, W / 2.0],
                    [0.0, 35.0, H / 2.0],
                    [0.0, 0.0, 1.0]]], jnp.float32)
    intrinsics = [K, K]
    eye = jnp.eye(4, dtype=jnp.float32)[None]
    pose_src = eye.at[0, 0, 3].set(0.1)   # small baseline between views
    poses = [eye, pose_src]
    keyview_idx = jnp.zeros((N,), jnp.int32)
    depth_range = (jnp.full((N,), 2.0, jnp.float32), jnp.full((N,), 10.0, jnp.float32))

    pred, aux = mvsnet_forward(params, images, poses, intrinsics, keyview_idx,
                               depth_range=depth_range, num_sampling_points=8)
    jax.block_until_ready((pred, aux))
    assert pred["depth"].shape == (N, 1, H // 4, W // 4)
    assert pred["depth_uncertainty"].shape == (N, 1, H // 4, W // 4)
    assert pred["invdepth"].shape == (N, 1, H // 4, W // 4)
    assert bool(jnp.all(jnp.isfinite(pred["depth"])))
    print("KERNEL_OK")
</pallas_src>

<mosaic_0001>
module attributes {stable_mosaic.version = 11 : i64} {
  func.func @_mm_kernel(%arg0: i32, %arg1: memref<1024x128xbf16, #tpu.memory_space<vmem>>, %arg2: memref<128x8xbf16, #tpu.memory_space<vmem>>, %arg3: memref<1024x8xbf16, #tpu.memory_space<vmem>>) attributes {dimension_semantics = [#tpu.dimension_semantics<parallel>], iteration_bounds = array<i64: 1>, scalar_prefetch = 0 : i64, scratch_operands = 0 : i64, tpu.core_type = #tpu.core_type<tc>, window_params = [{transform_indices = @transform_0, window_bounds = array<i64: 1024, 128>}, {pipeline_mode = #tpu.pipeline_mode<synchronous>, transform_indices = @transform_1, window_bounds = array<i64: 128, 8>}, {transform_indices = @transform_2, window_bounds = array<i64: 1024, 8>}]} {
    %c0 = arith.constant 0 : index
    %c0_0 = arith.constant 0 : index
    %0 = vector.load %arg1[%c0, %c0_0] : memref<1024x128xbf16, #tpu.memory_space<vmem>>, vector<1024x128xbf16>
    %c0_1 = arith.constant 0 : index
    %c0_2 = arith.constant 0 : index
    %1 = vector.load %arg2[%c0_1, %c0_2] : memref<128x8xbf16, #tpu.memory_space<vmem>>, vector<128x8xbf16>
    %cst = arith.constant dense<0.000000e+00> : vector<1024x8xf32>
    %2 = tpu.matmul %0, %1, %cst {dimension_numbers = #tpu.dot_dimension_numbers<[1], [0], [0], [1], [0, 0, 1, 1], [], []>} : vector<1024x128xbf16>, vector<128x8xbf16>, vector<1024x8xf32> -> vector<1024x8xf32>
    %cst_3 = arith.constant 0.000000e+00 : f32
    %3 = vector.broadcast %cst_3 : f32 to vector<1024x8xf32>
    %4 = arith.cmpf oge, %2, %3 : vector<1024x8xf32>
    %cst_4 = arith.constant 2.000000e-01 : f32
    %5 = vector.broadcast %cst_4 : f32 to vector<1024x8xf32>
    %6 = arith.mulf %5, %2 : vector<1024x8xf32>
    %7 = arith.select %4, %2, %6 : vector<1024x8xi1>, vector<1024x8xf32>
    %8 = arith.truncf %7 : vector<1024x8xf32> to vector<1024x8xbf16>
    %c0_5 = arith.constant 0 : index
    %c0_6 = arith.constant 0 : index
    %9 = vector.load %arg3[%c0_5, %c0_6] : memref<1024x8xbf16, #tpu.memory_space<vmem>>, vector<1024x8xbf16>
    tpu.vector_store %arg3[%c0_5, %c0_6], %8 {strides = array<i32>} : memref<1024x8xbf16, #tpu.memory_space<vmem>>, vector<1024x8xbf16>,
    return
  }
  func.func @transform_0(%arg0: i32) -> (i32, i32) {
    %c0_i32 = arith.constant 0 : i32
    %c0_i32_0 = arith.constant 0 : i32
    return %arg0, %c0_i32 : i32, i32
  }
  func.func @transform_1(%arg0: i32) -> (i32, i32) {
    %c0_i32 = arith.constant 0 : i32
    %c0_i32_0 = arith.constant 0 : i32
    %c0_i32_1 = arith.constant 0 : i32
    return %c0_i32, %c0_i32_0 : i32, i32
  }
  func.func @transform_2(%arg0: i32) -> (i32, i32) {
    %c0_i32 = arith.constant 0 : i32
    %c0_i32_0 = arith.constant 0 : i32
    return %arg0, %c0_i32 : i32, i32
  }
}

</mosaic_0001>

<bundles_post_ra>
// kernel: tpu_custom_call.1
= control target key start
LH: loop header
LB: loop body
LE: loop exit
PB: predicated region body
PF: predicated region fallthrough
CT: control target
= control target key end

     0   :  { %7 = vsyncpa [#allocation3], 0  ;;  %s1991_s12 = smov [#allocation2]   ;;  %s1992_s14 = smov 64   ;;  %s2548_s0 = inlined_call_operand.hbm [shape: bf16[1024,128], index: 0, kind: input, shape index: {}]   ;;  %s2549_s1 = inlined_call_operand.vmem [shape: bf16[128,8], index: 1, kind: input, shape index: {}]   ;;  %s2550_s2 = inlined_call_operand.vmem [shape: bf16[1024,8], index: 2, kind: output, shape index: {}]  }
   0x1   :  { %s12_s11 = sshll.u32 %s2548_s0, 4  ;;  %s14_s13 = sshll.u32 %s1991_s12, 4  ;;  %s13_s11 = int_to_ptr.hbm [resolvable:$true] %s12_s11  ;;  %s15_s13 = int_to_ptr.vmem [resolvable:$true] %s14_s13 }
   0x2   :  { %s1993_s15 = smov 4  }
   0x3   :  { %20 = dma.hbm_to_vmem [thread:$0]  %s13_s11, 8192, %s15_s13, [#allocation3], %s1992_s14, %s1992_s14, %s1993_s15  }
   0x4   :  { %1989 = dma.done.wait [#allocation3], 8192  }
   0x5   :  { %1990 = vsyncadd [#allocation3], 4294959104  ;;  %v1937_v0 = vld [vmem:[%s2549_s1 + $0x38] sm:$0xff]  ;;  %v1936_v1 = vld [vmem:[%s2549_s1 + $0x30] sm:$0xff]  ;;  %vm1444_vm2 = vcmask 60416  }
   0x6   :  { %603 = vmatpush.bf16.msra.mxu0 %v1937_v0  ;;  %1938 = vmatpush.bf16.msra.mxu1 %v1937_v0  ;;  %v1935_v2 = vld [vmem:[%s2549_s1 + $0x28] sm:$0xff]  ;;  %v1934_v3 = vld [vmem:[%s2549_s1 + $0x20] sm:$0xff]  ;;  %v1933_v4 = vld [vmem:[%s2549_s1 + $0x18] sm:$0xff] }
   0x7   :  { %1939 = vmatpush.bf16.msra.mxu2 %v1937_v0  ;;  %1940 = vmatpush.bf16.msra.mxu3 %v1937_v0  ;;  %v1932_v5 = vld [vmem:[%s2549_s1 + $0x10] sm:$0xff]  ;;  %v1931_v6 = vld [vmem:[%s2549_s1 + $0x8] sm:$0xff]  ;;  %v1930_v7 = vld [vmem:[%s2549_s1] sm:$0xff] }
   0x8   :  { %v1866_v8 = vld [vmem:[#allocation2] sm:$0xff]  ;;  %v1867_v12 = vld [vmem:[#allocation2 + $0x8] sm:$0xff]  ;;  %v1868_v16 = vld [vmem:[#allocation2 + $0x10] sm:$0xff] }
   0x9   :  { %v1882_v9 = vld [vmem:[#allocation2 + $0x80] sm:$0xff]  ;;  %v1883_v13 = vld [vmem:[#allocation2 + $0x88] sm:$0xff]  ;;  %v1884_v17 = vld [vmem:[#allocation2 + $0x90] sm:$0xff] }
   0xa   :  { %604 = vmatpush.bf16.msra.mxu0 %v1936_v1  ;;  %1941 = vmatpush.bf16.msra.mxu1 %v1936_v1  ;;  %v1898_v10 = vld [vmem:[#allocation2 + $0x100] sm:$0xff]  ;;  %v1899_v14 = vld [vmem:[#allocation2 + $0x108] sm:$0xff]  ;;  %v1900_v18 = vld [vmem:[#allocation2 + $0x110] sm:$0xff] }
   0xb   :  { %1942 = vmatpush.bf16.msra.mxu2 %v1936_v1  ;;  %1943 = vmatpush.bf16.msra.mxu3 %v1936_v1  ;;  %v1914_v11 = vld [vmem:[#allocation2 + $0x180] sm:$0xff]  ;;  %v1915_v15 = vld [vmem:[#allocation2 + $0x188] sm:$0xff]  ;;  %v1916_v19 = vld [vmem:[#allocation2 + $0x190] sm:$0xff] }
   0xc   :  { %v1869_v20 = vld [vmem:[#allocation2 + $0x18] sm:$0xff]  ;;  %v1870_v24 = vld [vmem:[#allocation2 + $0x20] sm:$0xff]  ;;  %v1871_v28 = vld [vmem:[#allocation2 + $0x28] sm:$0xff] }
   0xd   :  { %v1885_v21 = vld [vmem:[#allocation2 + $0x98] sm:$0xff]  ;;  %v1886_v25 = vld [vmem:[#allocation2 + $0xa0] sm:$0xff]  ;;  %v1887_v29 = vld [vmem:[#allocation2 + $0xa8] sm:$0xff] }
   0xe   :  { %605 = vmatpush.bf16.msra.mxu0 %v1935_v2  ;;  %1944 = vmatpush.bf16.msra.mxu1 %v1935_v2  ;;  %v1901_v22 = vld [vmem:[#allocation2 + $0x118] sm:$0xff]  ;;  %v1902_v26 = vld [vmem:[#allocation2 + $0x120] sm:$0xff]  ;;  %v1903_v30 = vld [vmem:[#allocation2 + $0x128] sm:$0xff] }
   0xf   :  { %1945 = vmatpush.bf16.msra.mxu2 %v1935_v2  ;;  %1946 = vmatpush.bf16.msra.mxu3 %v1935_v2  ;;  %v1917_v23 = vld [vmem:[#allocation2 + $0x198] sm:$0xff]  ;;  %v1918_v27 = vld [vmem:[#allocation2 + $0x1a0] sm:$0xff]  ;;  %v1919_v31 = vld [vmem:[#allocation2 + $0x1a8] sm:$0xff] }
  0x10   :  { %v1872_v32 = vld [vmem:[#allocation2 + $0x30] sm:$0xff]  ;;  %v1873_v36 = vld [vmem:[#allocation2 + $0x38] sm:$0xff]  ;;  %v1874_v40 = vld [vmem:[#allocation2 + $0x40] sm:$0xff] }
  0x11   :  { %v1888_v33 = vld [vmem:[#allocation2 + $0xb0] sm:$0xff]  ;;  %v1889_v37 = vld [vmem:[#allocation2 + $0xb8] sm:$0xff]  ;;  %v1890_v41 = vld [vmem:[#allocation2 + $0xc0] sm:$0xff] }
  0x12   :  { %606 = vmatpush.bf16.msra.mxu0 %v1934_v3  ;;  %1947 = vmatpush.bf16.msra.mxu1 %v1934_v3  ;;  %v1904_v34 = vld [vmem:[#allocation2 + $0x130] sm:$0xff]  ;;  %v1905_v38 = vld [vmem:[#allocation2 + $0x138] sm:$0xff]  ;;  %v1906_v44 = vld [vmem:[#allocation2 + $0x140] sm:$0xff] }
  0x13   :  { %1948 = vmatpush.bf16.msra.mxu2 %v1934_v3  ;;  %1949 = vmatpush.bf16.msra.mxu3 %v1934_v3  ;;  %v1920_v35 = vld [vmem:[#allocation2 + $0x1b0] sm:$0xff]  ;;  %v1921_v39 = vld [vmem:[#allocation2 + $0x1b8] sm:$0xff]  ;;  %v1922_v45 = vld [vmem:[#allocation2 + $0x1c0] sm:$0xff] }
  0x16   :  { %607 = vmatpush.bf16.msra.mxu0 %v1933_v4  ;;  %1950 = vmatpush.bf16.msra.mxu1 %v1933_v4 }
  0x17   :  { %1951 = vmatpush.bf16.msra.mxu2 %v1933_v4  ;;  %1952 = vmatpush.bf16.msra.mxu3 %v1933_v4  ;;  %v1875_v4 = vld [vmem:[#allocation2 + $0x48] sm:$0xff] }
  0x1a   :  { %608 = vmatpush.bf16.msra.mxu0 %v1932_v5  ;;  %1953 = vmatpush.bf16.msra.mxu1 %v1932_v5 }
  0x1b   :  { %1954 = vmatpush.bf16.msra.mxu2 %v1932_v5  ;;  %1955 = vmatpush.bf16.msra.mxu3 %v1932_v5 }
  0x1e   :  { %609 = vmatpush.bf16.msra.mxu0 %v1931_v6  ;;  %1956 = vmatpush.bf16.msra.mxu1 %v1931_v6 }
  0x1f   :  { %1957 = vmatpush.bf16.msra.mxu2 %v1931_v6  ;;  %1958 = vmatpush.bf16.msra.mxu3 %v1931_v6 }
  0x22   :  { %610 = vmatpush.bf16.msra.mxu0 %v1930_v7  ;;  %1959 = vmatpush.bf16.msra.mxu1 %v1930_v7 }
  0x23   :  { %1960 = vmatpush.bf16.msra.mxu2 %v1930_v7  ;;  %1961 = vmatpush.bf16.msra.mxu3 %v1930_v7  ;;  %v1891_v7 = vld [vmem:[#allocation2 + $0xc8] sm:$0xff] }
  0x25   :  { %611 = vmatmul.bf16.vlgmr.msra.gmra.mxu0 %v1866_v8  ;;  %691 = vmatmul.bf16.vlgmr.msra.gmra.mxu1 %v1882_v9  ;;  %v1907_v8 = vld [vmem:[#allocation2 + $0x148] sm:$0xff] }
  0x26   :  { %771 = vmatmul.bf16.vlgmr.msra.gmra.mxu2 %v1898_v10  ;;  %851 = vmatmul.bf16.vlgmr.msra.gmra.mxu3 %v1914_v11  ;;  %v1923_v9 = vld [vmem:[#allocation2 + $0x1c8] sm:$0xff] }
  0x35   :  { %616 = vmatmul.bf16.gmra.mxu0 %v1867_v12  ;;  %696 = vmatmul.bf16.gmra.mxu1 %v1883_v13 }
  0x36   :  { %776 = vmatmul.bf16.gmra.mxu2 %v1899_v14  ;;  %856 = vmatmul.bf16.gmra.mxu3 %v1915_v15 }
  0x45   :  { %621 = vmatmul.bf16.gmra.mxu0 %v1868_v16  ;;  %701 = vmatmul.bf16.gmra.mxu1 %v1884_v17 }
  0x46   :  { %781 = vmatmul.bf16.gmra.mxu2 %v1900_v18  ;;  %861 = vmatmul.bf16.gmra.mxu3 %v1916_v19 }
  0x55   :  { %626 = vmatmul.bf16.gmra.mxu0 %v1869_v20  ;;  %706 = vmatmul.bf16.gmra.mxu1 %v1885_v21 }
  0x56   :  { %786 = vmatmul.bf16.gmra.mxu2 %v1901_v22  ;;  %866 = vmatmul.bf16.gmra.mxu3 %v1917_v23 }
  0x65   :  { %631 = vmatmul.bf16.gmra.mxu0 %v1870_v24  ;;  %711 = vmatmul.bf16.gmra.mxu1 %v1886_v25 }
  0x66   :  { %791 = vmatmul.bf16.gmra.mxu2 %v1902_v26  ;;  %871 = vmatmul.bf16.gmra.mxu3 %v1918_v27 }
  0x75   :  { %636 = vmatmul.bf16.gmra.mxu0 %v1871_v28  ;;  %716 = vmatmul.bf16.gmra.mxu1 %v1887_v29 }
  0x76   :  { %796 = vmatmul.bf16.gmra.mxu2 %v1903_v30  ;;  %876 = vmatmul.bf16.gmra.mxu3 %v1919_v31 }
  0x85   :  { %641 = vmatmul.bf16.gmra.mxu0 %v1872_v32  ;;  %721 = vmatmul.bf16.gmra.mxu1 %v1888_v33 }
  0x86   :  { %801 = vmatmul.bf16.gmra.mxu2 %v1904_v34  ;;  %881 = vmatmul.bf16.gmra.mxu3 %v1920_v35 }
  0x95   :  { %646 = vmatmul.bf16.gmra.mxu0 %v1873_v36  ;;  %726 = vmatmul.bf16.gmra.mxu1 %v1889_v37 }
  0x96   :  { %806 = vmatmul.bf16.gmra.mxu2 %v1905_v38  ;;  %886 = vmatmul.bf16.gmra.mxu3 %v1921_v39 }
  0xa2   :  { %v612_v42 = vpop.f32.mrf.mxu0  ;;  %v692_v43 = vpop.f32.mrf.mxu1 }
  0xa3   :  { %vm932_vm0 = vcmp.ge.f32.partialorder %v612_v42, 0.0  ;;  %v1060_v46 = vmul.f32 0.2, %v612_v42  ;;  %vm964_vm1 = vcmp.ge.f32.partialorder %v692_v43, 0.0  ;;  %v1092_v47 = vmul.f32 0.2, %v692_v43 }
  0xa5   :  { %v1188_v48 = vsel %vm932_vm0, %v612_v42, %v1060_v46  ;;  %v1220_v49 = vsel %vm964_vm1, %v692_v43, %v1092_v47  ;;  %651 = vmatmul.bf16.gmra.mxu0 %v1874_v40  ;;  %731 = vmatmul.bf16.gmra.mxu1 %v1890_v41  ;;  %v1876_v40 = vld [vmem:[#allocation2 + $0x50] sm:$0xff] }
  0xa6   :  { %v1316_v50 = vpack.c.bf16 %v1188_v48, %v1188_v48  ;;  %v1348_v51 = vpack.c.bf16 %v1220_v49, %v1220_v49  ;;  %811 = vmatmul.bf16.gmra.mxu2 %v1906_v44  ;;  %891 = vmatmul.bf16.gmra.mxu3 %v1922_v45  ;;  %v1892_v43 = vld [vmem:[#allocation2 + $0xd0] sm:$0xff] }
  0xa7   :  { %v1908_v44 = vld [vmem:[#allocation2 + $0x150] sm:$0xff] }
  0xa8   :  { %1445 = vst.msk [vmem:[%s2550_s2] sm:$0xf] %vm1444_vm2, %v1316_v50  ;;  %v1924_v45 = vld [vmem:[#allocation2 + $0x1d0] sm:$0xff] }
  0xa9   :  { %1477 = vst.msk [vmem:[%s2550_s2 + $0x80] sm:$0xf] %vm1444_vm2, %v1348_v51  ;;  %v772_v52 = vpop.f32.mrf.mxu2  ;;  %v852_v53 = vpop.f32.mrf.mxu3 }
  0xaa   :  { %vm996_vm3 = vcmp.ge.f32.partialorder %v772_v52, 0.0  ;;  %v1124_v54 = vmul.f32 0.2, %v772_v52  ;;  %vm1028_vm4 = vcmp.ge.f32.partialorder %v852_v53, 0.0  ;;  %v1156_v55 = vmul.f32 0.2, %v852_v53  ;;  %v614_v56 = vpop.f32.mrf.mxu0  ;;  %v694_v57 = vpop.f32.mrf.mxu1 }
  0xab   :  { %vm933_vm5 = vcmp.ge.f32.partialorder %v614_v56, 0.0  ;;  %v1061_v58 = vmul.f32 0.2, %v614_v56  ;;  %vm965_vm6 = vcmp.ge.f32.partialorder %v694_v57, 0.0  ;;  %v1093_v59 = vmul.f32 0.2, %v694_v57 }
  0xac   :  { %v1252_v60 = vsel %vm996_vm3, %v772_v52, %v1124_v54  ;;  %v1284_v61 = vsel %vm1028_vm4, %v852_v53, %v1156_v55 }
  0xad   :  { %v1380_v62 = vpack.c.bf16 %v1252_v60, %v1252_v60  ;;  %v1412_v63 = vpack.c.bf16 %v1284_v61, %v1284_v61  ;;  %v1189_v0 = vsel %vm933_vm5, %v614_v56, %v1061_v58  ;;  %v1221_v1 = vsel %vm965_vm6, %v694_v57, %v1093_v59 }
  0xae   :  { %v1317_v2 = vpack.c.bf16 %v1189_v0, %v1189_v0  ;;  %v1349_v3 = vpack.c.bf16 %v1221_v1, %v1221_v1 }
  0xaf   :  { %1509 = vst.msk [vmem:[%s2550_s2 + $0x100] sm:$0xf] %vm1444_vm2, %v1380_v62 }
  0xb0   :  { %1541 = vst.msk [vmem:[%s2550_s2 + $0x180] sm:$0xf] %vm1444_vm2, %v1412_v63 }
  0xb1   :  { %1446 = vst.msk [vmem:[%s2550_s2 + $0x4] sm:$0xf] %vm1444_vm2, %v1317_v2  ;;  %v774_v5 = vpop.f32.mrf.mxu2  ;;  %v854_v6 = vpop.f32.mrf.mxu3 }
  0xb2   :  { %1478 = vst.msk [vmem:[%s2550_s2 + $0x84] sm:$0xf] %vm1444_vm2, %v1349_v3  ;;  %vm997_vm7 = vcmp.ge.f32.partialorder %v774_v5, 0.0  ;;  %v1125_v10 = vmul.f32 0.2, %v774_v5  ;;  %vm1029_vm8 = vcmp.ge.f32.partialorder %v854_v6, 0.0  ;;  %v617_v11 = vpop.f32.mrf.mxu0  ;;  %v697_v12 = vpop.f32.mrf.mxu1 }
  0xb3   :  { %v1157_v13 = vmul.f32 0.2, %v854_v6  ;;  %vm934_vm9 = vcmp.ge.f32.partialorder %v617_v11, 0.0  ;;  %v1062_v14 = vmul.f32 0.2, %v617_v11  ;;  %vm966_vm10 = vcmp.ge.f32.partialorder %v697_v12, 0.0 }
  0xb4   :  { %v1253_v15 = vsel %vm997_vm7, %v774_v5, %v1125_v10  ;;  %v1094_v16 = vmul.f32 0.2, %v697_v12 }
  0xb5   :  { %v1381_v17 = vpack.c.bf16 %v1253_v15, %v1253_v15  ;;  %v1285_v18 = vsel %vm1029_vm8, %v854_v6, %v1157_v13  ;;  %v1190_v19 = vsel %vm934_vm9, %v617_v11, %v1062_v14  ;;  %656 = vmatmul.bf16.gmra.mxu0 %v1875_v4  ;;  %736 = vmatmul.bf16.gmra.mxu1 %v1891_v7  ;;  %v1893_v15 = vld [vmem:[#allocation2 + $0xd8] sm:$0xff] }
  0xb6   :  { %v1413_v20 = vpack.c.bf16 %v1285_v18, %v1285_v18  ;;  %v1318_v21 = vpack.c.bf16 %v1190_v19, %v1190_v19  ;;  %v1222_v22 = vsel %vm966_vm10, %v697_v12, %v1094_v16  ;;  %816 = vmatmul.bf16.gmra.mxu2 %v1907_v8  ;;  %896 = vmatmul.bf16.gmra.mxu3 %v1923_v9  ;;  %v1877_v12 = vld [vmem:[#allocation2 + $0x58] sm:$0xff] }
  0xb7   :  { %1510 = vst.msk [vmem:[%s2550_s2 + $0x104] sm:$0xf] %vm1444_vm2, %v1381_v17  ;;  %v1350_v23 = vpack.c.bf16 %v1222_v22, %v1222_v22  ;;  %v1909_v16 = vld [vmem:[#allocation2 + $0x158] sm:$0xff] }
  0xb8   :  { %1542 = vst.msk [vmem:[%s2550_s2 + $0x184] sm:$0xf] %vm1444_vm2, %v1413_v20  ;;  %v1925_v17 = vld [vmem:[#allocation2 + $0x1d8] sm:$0xff] }
  0xb9   :  { %1447 = vst.msk [vmem:[%s2550_s2 + $0x8] sm:$0xf] %vm1444_vm2, %v1318_v21  ;;  %v777_v24 = vpop.f32.mrf.mxu2  ;;  %v857_v25 = vpop.f32.mrf.mxu3 }
  0xba   :  { %1479 = vst.msk [vmem:[%s2550_s2 + $0x88] sm:$0xf] %vm1444_vm2, %v1350_v23  ;;  %vm998_vm11 = vcmp.ge.f32.partialorder %v777_v24, 0.0  ;;  %v1126_v26 = vmul.f32 0.2, %v777_v24  ;;  %vm1030_vm12 = vcmp.ge.f32.partialorder %v857_v25, 0.0  ;;  %v619_v27 = vpop.f32.mrf.mxu0  ;;  %v699_v28 = vpop.f32.mrf.mxu1 }
  0xbb   :  { %v1158_v29 = vmul.f32 0.2, %v857_v25  ;;  %vm935_vm13 = vcmp.ge.f32.partialorder %v619_v27, 0.0  ;;  %v1063_v30 = vmul.f32 0.2, %v619_v27  ;;  %vm967_vm14 = vcmp.ge.f32.partialorder %v699_v28, 0.0 }
  0xbc   :  { %v1254_v31 = vsel %vm998_vm11, %v777_v24, %v1126_v26  ;;  %v1095_v32 = vmul.f32 0.2, %v699_v28 }
  0xbd   :  { %v1382_v33 = vpack.c.bf16 %v1254_v31, %v1254_v31  ;;  %v1286_v34 = vsel %vm1030_vm12, %v857_v25, %v1158_v29  ;;  %v1191_v35 = vsel %vm935_vm13, %v619_v27, %v1063_v30 }
  0xbe   :  { %v1414_v36 = vpack.c.bf16 %v1286_v34, %v1286_v34  ;;  %v1319_v37 = vpack.c.bf16 %v1191_v35, %v1191_v35  ;;  %v1223_v38 = vsel %vm967_vm14, %v699_v28, %v1095_v32 }
  0xbf   :  { %1511 = vst.msk [vmem:[%s2550_s2 + $0x108] sm:$0xf] %vm1444_vm2, %v1382_v33  ;;  %v1351_v39 = vpack.c.bf16 %v1223_v38, %v1223_v38 }
  0xc0   :  { %1543 = vst.msk [vmem:[%s2550_s2 + $0x188] sm:$0xf] %vm1444_vm2, %v1414_v36 }
  0xc1   :  { %1448 = vst.msk [vmem:[%s2550_s2 + $0xc] sm:$0xf] %vm1444_vm2, %v1319_v37  ;;  %v779_v41 = vpop.f32.mrf.mxu2  ;;  %v859_v42 = vpop.f32.mrf.mxu3 }
  0xc2   :  { %1480 = vst.msk [vmem:[%s2550_s2 + $0x8c] sm:$0xf] %vm1444_vm2, %v1351_v39  ;;  %vm999_vm15 = vcmp.ge.f32.partialorder %v779_v41, 0.0  ;;  %v1127_v46 = vmul.f32 0.2, %v779_v41  ;;  %vm1031_vm0 = vcmp.ge.f32.partialorder %v859_v42, 0.0  ;;  %v622_v47 = vpop.f32.mrf.mxu0  ;;  %v702_v48 = vpop.f32.mrf.mxu1 }
  0xc3   :  { %v1159_v49 = vmul.f32 0.2, %v859_v42  ;;  %vm936_vm1 = vcmp.ge.f32.partialorder %v622_v47, 0.0  ;;  %v1064_v50 = vmul.f32 0.2, %v622_v47  ;;  %vm968_vm3 = vcmp.ge.f32.partialorder %v702_v48, 0.0 }
  0xc4   :  { %v1255_v51 = vsel %vm999_vm15, %v779_v41, %v1127_v46  ;;  %v1096_v52 = vmul.f32 0.2, %v702_v48 }
  0xc5   :  { %v1383_v53 = vpack.c.bf16 %v1255_v51, %v1255_v51  ;;  %v1287_v54 = vsel %vm1031_vm0, %v859_v42, %v1159_v49  ;;  %v1192_v55 = vsel %vm936_vm1, %v622_v47, %v1064_v50  ;;  %661 = vmatmul.bf16.gmra.mxu0 %v1876_v40  ;;  %741 = vmatmul.bf16.gmra.mxu1 %v1892_v43  ;;  %v1894_v51 = vld [vmem:[#allocation2 + $0xe0] sm:$0xff] }
  0xc6   :  { %v1415_v56 = vpack.c.bf16 %v1287_v54, %v1287_v54  ;;  %v1320_v57 = vpack.c.bf16 %v1192_v55, %v1192_v55  ;;  %v1224_v58 = vsel %vm968_vm3, %v702_v48, %v1096_v52  ;;  %821 = vmatmul.bf16.gmra.mxu2 %v1908_v44  ;;  %901 = vmatmul.bf16.gmra.mxu3 %v1924_v45  ;;  %v1878_v48 = vld [vmem:[#allocation2 + $0x60] sm:$0xff] }
  0xc7   :  { %1512 = vst.msk [vmem:[%s2550_s2 + $0x10c] sm:$0xf] %vm1444_vm2, %v1383_v53  ;;  %v1352_v59 = vpack.c.bf16 %v1224_v58, %v1224_v58  ;;  %v1910_v52 = vld [vmem:[#allocation2 + $0x160] sm:$0xff] }
  0xc8   :  { %1544 = vst.msk [vmem:[%s2550_s2 + $0x18c] sm:$0xf] %vm1444_vm2, %v1415_v56  ;;  %v1926_v53 = vld [vmem:[#allocation2 + $0x1e0] sm:$0xff] }
  0xc9   :  { %1449 = vst.msk [vmem:[%s2550_s2 + $0x10] sm:$0xf] %vm1444_vm2, %v1320_v57  ;;  %v782_v60 = vpop.f32.mrf.mxu2  ;;  %v862_v61 = vpop.f32.mrf.mxu3 }
  0xca   :  { %1481 = vst.msk [vmem:[%s2550_s2 + $0x90] sm:$0xf] %vm1444_vm2, %v1352_v59  ;;  %vm1000_vm4 = vcmp.ge.f32.partialorder %v782_v60, 0.0  ;;  %v1128_v62 = vmul.f32 0.2, %v782_v60  ;;  %vm1032_vm5 = vcmp.ge.f32.partialorder %v862_v61, 0.0  ;;  %v624_v63 = vpop.f32.mrf.mxu0  ;;  %v704_v0 = vpop.f32.mrf.mxu1 }
  0xcb   :  { %v1160_v1 = vmul.f32 0.2, %v862_v61  ;;  %vm937_vm6 = vcmp.ge.f32.partialorder %v624_v63, 0.0  ;;  %v1065_v2 = vmul.f32 0.2, %v624_v63  ;;  %vm969_vm7 = vcmp.ge.f32.partialorder %v704_v0, 0.0 }
  0xcc   :  { %v1256_v3 = vsel %vm1000_vm4, %v782_v60, %v1128_v62  ;;  %v1097_v4 = vmul.f32 0.2, %v704_v0 }
  0xcd   :  { %v1384_v5 = vpack.c.bf16 %v1256_v3, %v1256_v3  ;;  %v1288_v6 = vsel %vm1032_vm5, %v862_v61, %v1160_v1  ;;  %v1193_v7 = vsel %vm937_vm6, %v624_v63, %v1065_v2 }
  0xce   :  { %v1416_v8 = vpack.c.bf16 %v1288_v6, %v1288_v6  ;;  %v1321_v9 = vpack.c.bf16 %v1193_v7, %v1193_v7  ;;  %v1225_v10 = vsel %vm969_vm7, %v704_v0, %v1097_v4 }
  0xcf   :  { %1513 = vst.msk [vmem:[%s2550_s2 + $0x110] sm:$0xf] %vm1444_vm2, %v1384_v5  ;;  %v1353_v11 = vpack.c.bf16 %v1225_v10, %v1225_v10 }
  0xd0   :  { %1545 = vst.msk [vmem:[%s2550_s2 + $0x190] sm:$0xf] %vm1444_vm2, %v1416_v8 }
  0xd1   :  { %1450 = vst.msk [vmem:[%s2550_s2 + $0x14] sm:$0xf] %vm1444_vm2, %v1321_v9  ;;  %v784_v13 = vpop.f32.mrf.mxu2  ;;  %v864_v14 = vpop.f32.mrf.mxu3 }
  0xd2   :  { %1482 = vst.msk [vmem:[%s2550_s2 + $0x94] sm:$0xf] %vm1444_vm2, %v1353_v11  ;;  %vm1001_vm8 = vcmp.ge.f32.partialorder %v784_v13, 0.0  ;;  %v1129_v18 = vmul.f32 0.2, %v784_v13  ;;  %vm1033_vm9 = vcmp.ge.f32.partialorder %v864_v14, 0.0  ;;  %v627_v19 = vpop.f32.mrf.mxu0  ;;  %v707_v20 = vpop.f32.mrf.mxu1 }
  0xd3   :  { %v1161_v21 = vmul.f32 0.2, %v864_v14  ;;  %vm938_vm10 = vcmp.ge.f32.partialorder %v627_v19, 0.0  ;;  %v1066_v22 = vmul.f32 0.2, %v627_v19  ;;  %vm970_vm11 = vcmp.ge.f32.partialorder %v707_v20, 0.0 }
  0xd4   :  { %v1257_v23 = vsel %vm1001_vm8, %v784_v13, %v1129_v18  ;;  %v1098_v24 = vmul.f32 0.2, %v707_v20 }
  0xd5   :  { %v1385_v25 = vpack.c.bf16 %v1257_v23, %v1257_v23  ;;  %v1289_v26 = vsel %vm1033_vm9, %v864_v14, %v1161_v21  ;;  %v1194_v27 = vsel %vm938_vm10, %v627_v19, %v1066_v22  ;;  %666 = vmatmul.bf16.gmra.mxu0 %v1877_v12  ;;  %746 = vmatmul.bf16.gmra.mxu1 %v1893_v15  ;;  %v1895_v23 = vld [vmem:[#allocation2 + $0xe8] sm:$0xff] }
  0xd6   :  { %v1417_v28 = vpack.c.bf16 %v1289_v26, %v1289_v26  ;;  %v1322_v29 = vpack.c.bf16 %v1194_v27, %v1194_v27  ;;  %v1226_v30 = vsel %vm970_vm11, %v707_v20, %v1098_v24  ;;  %826 = vmatmul.bf16.gmra.mxu2 %v1909_v16  ;;  %906 = vmatmul.bf16.gmra.mxu3 %v1925_v17  ;;  %v1879_v20 = vld [vmem:[#allocation2 + $0x68] sm:$0xff] }
  0xd7   :  { %1514 = vst.msk [vmem:[%s2550_s2 + $0x114] sm:$0xf] %vm1444_vm2, %v1385_v25  ;;  %v1354_v31 = vpack.c.bf16 %v1226_v30, %v1226_v30  ;;  %v1911_v24 = vld [vmem:[#allocation2 + $0x168] sm:$0xff] }
  0xd8   :  { %1546 = vst.msk [vmem:[%s2550_s2 + $0x194] sm:$0xf] %vm1444_vm2, %v1417_v28  ;;  %v1927_v25 = vld [vmem:[#allocation2 + $0x1e8] sm:$0xff] }
  0xd9   :  { %1451 = vst.msk [vmem:[%s2550_s2 + $0x18] sm:$0xf] %vm1444_vm2, %v1322_v29  ;;  %v787_v32 = vpop.f32.mrf.mxu2  ;;  %v867_v33 = vpop.f32.mrf.mxu3 }
  0xda   :  { %1483 = vst.msk [vmem:[%s2550_s2 + $0x98] sm:$0xf] %vm1444_vm2, %v1354_v31  ;;  %vm1002_vm12 = vcmp.ge.f32.partialorder %v787_v32, 0.0  ;;  %v1130_v34 = vmul.f32 0.2, %v787_v32  ;;  %vm1034_vm13 = vcmp.ge.f32.partialorder %v867_v33, 0.0  ;;  %v629_v35 = vpop.f32.mrf.mxu0  ;;  %v709_v36 = vpop.f32.mrf.mxu1 }
  0xdb   :  { %v1162_v37 = vmul.f32 0.2, %v867_v33  ;;  %vm939_vm14 = vcmp.ge.f32.partialorder %v629_v35, 0.0  ;;  %v1067_v38 = vmul.f32 0.2, %v629_v35  ;;  %vm971_vm15 = vcmp.ge.f32.partialorder %v709_v36, 0.0 }
  0xdc   :  { %v1258_v39 = vsel %vm1002_vm12, %v787_v32, %v1130_v34  ;;  %v1099_v40 = vmul.f32 0.2, %v709_v36 }
  0xdd   :  { %v1386_v41 = vpack.c.bf16 %v1258_v39, %v1258_v39  ;;  %v1290_v42 = vsel %vm1034_vm13, %v867_v33, %v1162_v37  ;;  %v1195_v43 = vsel %vm939_vm14, %v629_v35, %v1067_v38 }
  0xde   :  { %v1418_v44 = vpack.c.bf16 %v1290_v42, %v1290_v42  ;;  %v1323_v45 = vpack.c.bf16 %v1195_v43, %v1195_v43  ;;  %v1227_v46 = vsel %vm971_vm15, %v709_v36, %v1099_v40 }
  0xdf   :  { %1515 = vst.msk [vmem:[%s2550_s2 + $0x118] sm:$0xf] %vm1444_vm2, %v1386_v41  ;;  %v1355_v47 = vpack.c.bf16 %v1227_v46, %v1227_v46 }
  0xe0   :  { %1547 = vst.msk [vmem:[%s2550_s2 + $0x198] sm:$0xf] %vm1444_vm2, %v1418_v44 }
  0xe1   :  { %1452 = vst.msk [vmem:[%s2550_s2 + $0x1c] sm:$0xf] %vm1444_vm2, %v1323_v45  ;;  %v789_v49 = vpop.f32.mrf.mxu2  ;;  %v869_v50 = vpop.f32.mrf.mxu3 }
  0xe2   :  { %1484 = vst.msk [vmem:[%s2550_s2 + $0x9c] sm:$0xf] %vm1444_vm2, %v1355_v47  ;;  %vm1003_vm0 = vcmp.ge.f32.partialorder %v789_v49, 0.0  ;;  %v1131_v54 = vmul.f32 0.2, %v789_v49  ;;  %vm1035_vm1 = vcmp.ge.f32.partialorder %v869_v50, 0.0  ;;  %v632_v55 = vpop.f32.mrf.mxu0  ;;  %v712_v56 = vpop.f32.mrf.mxu1 }
  0xe3   :  { %v1163_v57 = vmul.f32 0.2, %v869_v50  ;;  %vm940_vm3 = vcmp.ge.f32.partialorder %v632_v55, 0.0  ;;  %v1068_v58 = vmul.f32 0.2, %v632_v55  ;;  %vm972_vm4 = vcmp.ge.f32.partialorder %v712_v56, 0.0 }
  0xe4   :  { %v1259_v59 = vsel %vm1003_vm0, %v789_v49, %v1131_v54  ;;  %v1100_v60 = vmul.f32 0.2, %v712_v56 }
  0xe5   :  { %v1387_v61 = vpack.c.bf16 %v1259_v59, %v1259_v59  ;;  %v1291_v62 = vsel %vm1035_vm1, %v869_v50, %v1163_v57  ;;  %v1196_v63 = vsel %vm940_vm3, %v632_v55, %v1068_v58  ;;  %671 = vmatmul.bf16.gmra.mxu0 %v1878_v48  ;;  %751 = vmatmul.bf16.gmra.mxu1 %v1894_v51  ;;  %v1896_v59 = vld [vmem:[#allocation2 + $0xf0] sm:$0xff] }
  0xe6   :  { %v1419_v0 = vpack.c.bf16 %v1291_v62, %v1291_v62  ;;  %v1324_v1 = vpack.c.bf16 %v1196_v63, %v1196_v63  ;;  %v1228_v2 = vsel %vm972_vm4, %v712_v56, %v1100_v60  ;;  %831 = vmatmul.bf16.gmra.mxu2 %v1910_v52  ;;  %911 = vmatmul.bf16.gmra.mxu3 %v1926_v53  ;;  %v1880_v56 = vld [vmem:[#allocation2 + $0x70] sm:$0xff] }
  0xe7   :  { %1516 = vst.msk [vmem:[%s2550_s2 + $0x11c] sm:$0xf] %vm1444_vm2, %v1387_v61  ;;  %v1356_v3 = vpack.c.bf16 %v1228_v2, %v1228_v2  ;;  %v1912_v60 = vld [vmem:[#allocation2 + $0x170] sm:$0xff] }
  0xe8   :  { %1548 = vst.msk [vmem:[%s2550_s2 + $0x19c] sm:$0xf] %vm1444_vm2, %v1419_v0  ;;  %v1928_v61 = vld [vmem:[#allocation2 + $0x1f0] sm:$0xff] }
  0xe9   :  { %1453 = vst.msk [vmem:[%s2550_s2 + $0x20] sm:$0xf] %vm1444_vm2, %v1324_v1  ;;  %v792_v4 = vpop.f32.mrf.mxu2  ;;  %v872_v5 = vpop.f32.mrf.mxu3 }
  0xea   :  { %1485 = vst.msk [vmem:[%s2550_s2 + $0xa0] sm:$0xf] %vm1444_vm2, %v1356_v3  ;;  %vm1004_vm5 = vcmp.ge.f32.partialorder %v792_v4, 0.0  ;;  %v1132_v6 = vmul.f32 0.2, %v792_v4  ;;  %vm1036_vm6 = vcmp.ge.f32.partialorder %v872_v5, 0.0  ;;  %v634_v7 = vpop.f32.mrf.mxu0  ;;  %v714_v8 = vpop.f32.mrf.mxu1 }
  0xeb   :  { %v1164_v9 = vmul.f32 0.2, %v872_v5  ;;  %vm941_vm7 = vcmp.ge.f32.partialorder %v634_v7, 0.0  ;;  %v1069_v10 = vmul.f32 0.2, %v634_v7  ;;  %vm973_vm8 = vcmp.ge.f32.partialorder %v714_v8, 0.0 }
  0xec   :  { %v1260_v11 = vsel %vm1004_vm5, %v792_v4, %v1132_v6  ;;  %v1101_v12 = vmul.f32 0.2, %v714_v8 }
  0xed   :  { %v1388_v13 = vpack.c.bf16 %v1260_v11, %v1260_v11  ;;  %v1292_v14 = vsel %vm1036_vm6, %v872_v5, %v1164_v9  ;;  %v1197_v15 = vsel %vm941_vm7, %v634_v7, %v1069_v10 }
  0xee   :  { %v1420_v16 = vpack.c.bf16 %v1292_v14, %v1292_v14  ;;  %v1325_v17 = vpack.c.bf16 %v1197_v15, %v1197_v15  ;;  %v1229_v18 = vsel %vm973_vm8, %v714_v8, %v1101_v12 }
  0xef   :  { %1517 = vst.msk [vmem:[%s2550_s2 + $0x120] sm:$0xf] %vm1444_vm2, %v1388_v13  ;;  %v1357_v19 = vpack.c.bf16 %v1229_v18, %v1229_v18 }
  0xf0   :  { %1549 = vst.msk [vmem:[%s2550_s2 + $0x1a0] sm:$0xf] %vm1444_vm2, %v1420_v16 }
  0xf1   :  { %1454 = vst.msk [vmem:[%s2550_s2 + $0x24] sm:$0xf] %vm1444_vm2, %v1325_v17  ;;  %v794_v21 = vpop.f32.mrf.mxu2  ;;  %v874_v22 = vpop.f32.mrf.mxu3 }
  0xf2   :  { %1486 = vst.msk [vmem:[%s2550_s2 + $0xa4] sm:$0xf] %vm1444_vm2, %v1357_v19  ;;  %vm1005_vm9 = vcmp.ge.f32.partialorder %v794_v21, 0.0  ;;  %v1133_v26 = vmul.f32 0.2, %v794_v21  ;;  %vm1037_vm10 = vcmp.ge.f32.partialorder %v874_v22, 0.0  ;;  %v637_v27 = vpop.f32.mrf.mxu0  ;;  %v717_v28 = vpop.f32.mrf.mxu1 }
  0xf3   :  { %v1165_v29 = vmul.f32 0.2, %v874_v22  ;;  %vm942_vm11 = vcmp.ge.f32.partialorder %v637_v27, 0.0  ;;  %v1070_v30 = vmul.f32 0.2, %v637_v27  ;;  %vm974_vm12 = vcmp.ge.f32.partialorder %v717_v28, 0.0 }
  0xf4   :  { %v1261_v31 = vsel %vm1005_vm9, %v794_v21, %v1133_v26  ;;  %v1102_v32 = vmul.f32 0.2, %v717_v28 }
  0xf5   :  { %v1389_v33 = vpack.c.bf16 %v1261_v31, %v1261_v31  ;;  %v1293_v34 = vsel %vm1037_vm10, %v874_v22, %v1165_v29  ;;  %v1198_v35 = vsel %vm942_vm11, %v637_v27, %v1070_v30  ;;  %676 = vmatmul.bf16.gmra.mxu0 %v1879_v20  ;;  %756 = vmatmul.bf16.gmra.mxu1 %v1895_v23  ;;  %v1897_v31 = vld [vmem:[#allocation2 + $0xf8] sm:$0xff] }
  0xf6   :  { %v1421_v36 = vpack.c.bf16 %v1293_v34, %v1293_v34  ;;  %v1326_v37 = vpack.c.bf16 %v1198_v35, %v1198_v35  ;;  %v1230_v38 = vsel %vm974_vm12, %v717_v28, %v1102_v32  ;;  %836 = vmatmul.bf16.gmra.mxu2 %v1911_v24  ;;  %916 = vmatmul.bf16.gmra.mxu3 %v1927_v25  ;;  %v1881_v28 = vld [vmem:[#allocation2 + $0x78] sm:$0xff] }
  0xf7   :  { %1518 = vst.msk [vmem:[%s2550_s2 + $0x124] sm:$0xf] %vm1444_vm2, %v1389_v33  ;;  %v1358_v39 = vpack.c.bf16 %v1230_v38, %v1230_v38  ;;  %v1913_v32 = vld [vmem:[#allocation2 + $0x178] sm:$0xff] }
  0xf8   :  { %1550 = vst.msk [vmem:[%s2550_s2 + $0x1a4] sm:$0xf] %vm1444_vm2, %v1421_v36  ;;  %v1929_v33 = vld [vmem:[#allocation2 + $0x1f8] sm:$0xff] }
  0xf9   :  { %1455 = vst.msk [vmem:[%s2550_s2 + $0x28] sm:$0xf] %vm1444_vm2, %v1326_v37  ;;  %v797_v40 = vpop.f32.mrf.mxu2  ;;  %v877_v41 = vpop.f32.mrf.mxu3 }
  0xfa   :  { %1487 = vst.msk [vmem:[%s2550_s2 + $0xa8] sm:$0xf] %vm1444_vm2, %v1358_v39  ;;  %vm1006_vm13 = vcmp.ge.f32.partialorder %v797_v40, 0.0  ;;  %v1134_v42 = vmul.f32 0.2, %v797_v40  ;;  %vm1038_vm14 = vcmp.ge.f32.partialorder %v877_v41, 0.0  ;;  %v639_v43 = vpop.f32.mrf.mxu0  ;;  %v719_v44 = vpop.f32.mrf.mxu1 }
  0xfb   :  { %v1166_v45 = vmul.f32 0.2, %v877_v41  ;;  %vm943_vm15 = vcmp.ge.f32.partialorder %v639_v43, 0.0  ;;  %v1071_v46 = vmul.f32 0.2, %v639_v43  ;;  %vm975_vm0 = vcmp.ge.f32.partialorder %v719_v44, 0.0 }
  0xfc   :  { %v1262_v47 = vsel %vm1006_vm13, %v797_v40, %v1134_v42  ;;  %v1103_v48 = vmul.f32 0.2, %v719_v44 }
  0xfd   :  { %v1390_v49 = vpack.c.bf16 %v1262_v47, %v1262_v47  ;;  %v1294_v50 = vsel %vm1038_vm14, %v877_v41, %v1166_v45  ;;  %v1199_v51 = vsel %vm943_vm15, %v639_v43, %v1071_v46 }
  0xfe   :  { %v1422_v52 = vpack.c.bf16 %v1294_v50, %v1294_v50  ;;  %v1327_v53 = vpack.c.bf16 %v1199_v51, %v1199_v51  ;;  %v1231_v54 = vsel %vm975_vm0, %v719_v44, %v1103_v48 }
  0xff   :  { %1519 = vst.msk [vmem:[%s2550_s2 + $0x128] sm:$0xf] %vm1444_vm2, %v1390_v49  ;;  %v1359_v55 = vpack.c.bf16 %v1231_v54, %v1231_v54 }
 0x100   :  { %1551 = vst.msk [vmem:[%s2550_s2 + $0x1a8] sm:$0xf] %vm1444_vm2, %v1422_v52 }
 0x101   :  { %1456 = vst.msk [vmem:[%s2550_s2 + $0x2c] sm:$0xf] %vm1444_vm2, %v1327_v53  ;;  %v799_v57 = vpop.f32.mrf.mxu2  ;;  %v879_v58 = vpop.f32.mrf.mxu3 }
 0x102   :  { %1488 = vst.msk [vmem:[%s2550_s2 + $0xac] sm:$0xf] %vm1444_vm2, %v1359_v55  ;;  %vm1007_vm1 = vcmp.ge.f32.partialorder %v799_v57, 0.0  ;;  %v1135_v62 = vmul.f32 0.2, %v799_v57  ;;  %vm1039_vm3 = vcmp.ge.f32.partialorder %v879_v58, 0.0  ;;  %v642_v63 = vpop.f32.mrf.mxu0  ;;  %v722_v0 = vpop.f32.mrf.mxu1 }
 0x103   :  { %v1167_v1 = vmul.f32 0.2, %v879_v58  ;;  %vm944_vm4 = vcmp.ge.f32.partialorder %v642_v63, 0.0  ;;  %v1072_v2 = vmul.f32 0.2, %v642_v63  ;;  %vm976_vm5 = vcmp.ge.f32.partialorder %v722_v0, 0.0 }
 0x104   :  { %v1263_v3 = vsel %vm1007_vm1, %v799_v57, %v1135_v62  ;;  %v1104_v4 = vmul.f32 0.2, %v722_v0 }
 0x105   :  { %v1391_v5 = vpack.c.bf16 %v1263_v3, %v1263_v3  ;;  %v1295_v6 = vsel %vm1039_vm3, %v879_v58, %v1167_v1  ;;  %v1200_v7 = vsel %vm944_vm4, %v642_v63, %v1072_v2  ;;  %681 = vmatmul.bf16.gmra.mxu0 %v1880_v56  ;;  %761 = vmatmul.bf16.gmra.mxu1 %v1896_v59 }
 0x106   :  { %v1423_v8 = vpack.c.bf16 %v1295_v6, %v1295_v6  ;;  %v1328_v9 = vpack.c.bf16 %v1200_v7, %v1200_v7  ;;  %v1232_v10 = vsel %vm976_vm5, %v722_v0, %v1104_v4  ;;  %841 = vmatmul.bf16.gmra.mxu2 %v1912_v60  ;;  %921 = vmatmul.bf16.gmra.mxu3 %v1928_v61 }
 0x107   :  { %1520 = vst.msk [vmem:[%s2550_s2 + $0x12c] sm:$0xf] %vm1444_vm2, %v1391_v5  ;;  %v1360_v11 = vpack.c.bf16 %v1232_v10, %v1232_v10 }
 0x108   :  { %1552 = vst.msk [vmem:[%s2550_s2 + $0x1ac] sm:$0xf] %vm1444_vm2, %v1423_v8 }
 0x109   :  { %1457 = vst.msk [vmem:[%s2550_s2 + $0x30] sm:$0xf] %vm1444_vm2, %v1328_v9  ;;  %v802_v12 = vpop.f32.mrf.mxu2  ;;  %v882_v13 = vpop.f32.mrf.mxu3 }
 0x10a   :  { %1489 = vst.msk [vmem:[%s2550_s2 + $0xb0] sm:$0xf] %vm1444_vm2, %v1360_v11  ;;  %vm1008_vm6 = vcmp.ge.f32.partialorder %v802_v12, 0.0  ;;  %v1136_v14 = vmul.f32 0.2, %v802_v12  ;;  %vm1040_vm7 = vcmp.ge.f32.partialorder %v882_v13, 0.0  ;;  %v644_v15 = vpop.f32.mrf.mxu0  ;;  %v724_v16 = vpop.f32.mrf.mxu1 }
 0x10b   :  { %v1168_v17 = vmul.f32 0.2, %v882_v13  ;;  %vm945_vm8 = vcmp.ge.f32.partialorder %v644_v15, 0.0  ;;  %v1073_v18 = vmul.f32 0.2, %v644_v15  ;;  %vm977_vm9 = vcmp.ge.f32.partialorder %v724_v16, 0.0 }
 0x10c   :  { %v1264_v19 = vsel %vm1008_vm6, %v802_v12, %v1136_v14  ;;  %v1105_v20 = vmul.f32 0.2, %v724_v16 }
 0x10d   :  { %v1392_v21 = vpack.c.bf16 %v1264_v19, %v1264_v19  ;;  %v1296_v22 = vsel %vm1040_vm7, %v882_v13, %v1168_v17  ;;  %v1201_v23 = vsel %vm945_vm8, %v644_v15, %v1073_v18 }
 0x10e   :  { %v1424_v24 = vpack.c.bf16 %v1296_v22, %v1296_v22  ;;  %v1329_v25 = vpack.c.bf16 %v1201_v23, %v1201_v23  ;;  %v1233_v26 = vsel %vm977_vm9, %v724_v16, %v1105_v20 }
 0x10f   :  { %1521 = vst.msk [vmem:[%s2550_s2 + $0x130] sm:$0xf] %vm1444_vm2, %v1392_v21  ;;  %v1361_v27 = vpack.c.bf16 %v1233_v26, %v1233_v26 }
 0x110   :  { %1553 = vst.msk [vmem:[%s2550_s2 + $0x1b0] sm:$0xf] %vm1444_vm2, %v1424_v24 }
 0x111   :  { %1458 = vst.msk [vmem:[%s2550_s2 + $0x34] sm:$0xf] %vm1444_vm2, %v1329_v25  ;;  %v804_v29 = vpop.f32.mrf.mxu2  ;;  %v884_v30 = vpop.f32.mrf.mxu3 }
 0x112   :  { %1490 = vst.msk [vmem:[%s2550_s2 + $0xb4] sm:$0xf] %vm1444_vm2, %v1361_v27  ;;  %vm1009_vm10 = vcmp.ge.f32.partialorder %v804_v29, 0.0  ;;  %v1137_v34 = vmul.f32 0.2, %v804_v29  ;;  %vm1041_vm11 = vcmp.ge.f32.partialorder %v884_v30, 0.0  ;;  %v647_v35 = vpop.f32.mrf.mxu0  ;;  %v727_v36 = vpop.f32.mrf.mxu1 }
 0x113   :  { %v1169_v37 = vmul.f32 0.2, %v884_v30  ;;  %vm946_vm12 = vcmp.ge.f32.partialorder %v647_v35, 0.0  ;;  %v1074_v38 = vmul.f32 0.2, %v647_v35  ;;  %vm978_vm13 = vcmp.ge.f32.partialorder %v727_v36, 0.0 }
 0x114   :  { %v1265_v39 = vsel %vm1009_vm10, %v804_v29, %v1137_v34  ;;  %v1106_v40 = vmul.f32 0.2, %v727_v36 }
 0x115   :  { %v1393_v41 = vpack.c.bf16 %v1265_v39, %v1265_v39  ;;  %v1297_v42 = vsel %vm1041_vm11, %v884_v30, %v1169_v37  ;;  %v1202_v43 = vsel %vm946_vm12, %v647_v35, %v1074_v38  ;;  %686 = vmatmul.bf16.gmra.mxu0 %v1881_v28  ;;  %766 = vmatmul.bf16.gmra.mxu1 %v1897_v31 }
 0x116   :  { %v1425_v44 = vpack.c.bf16 %v1297_v42, %v1297_v42  ;;  %v1330_v45 = vpack.c.bf16 %v1202_v43, %v1202_v43  ;;  %v1234_v46 = vsel %vm978_vm13, %v727_v36, %v1106_v40  ;;  %846 = vmatmul.bf16.gmra.mxu2 %v1913_v32  ;;  %926 = vmatmul.bf16.gmra.mxu3 %v1929_v33 }
 0x117   :  { %1522 = vst.msk [vmem:[%s2550_s2 + $0x134] sm:$0xf] %vm1444_vm2, %v1393_v41  ;;  %v1362_v47 = vpack.c.bf16 %v1234_v46, %v1234_v46 }
 0x118   :  { %1554 = vst.msk [vmem:[%s2550_s2 + $0x1b4] sm:$0xf] %vm1444_vm2, %v1425_v44 }
 0x119   :  { %1459 = vst.msk [vmem:[%s2550_s2 + $0x38] sm:$0xf] %vm1444_vm2, %v1330_v45  ;;  %v807_v48 = vpop.f32.mrf.mxu2  ;;  %v887_v49 = vpop.f32.mrf.mxu3 }
 0x11a   :  { %1491 = vst.msk [vmem:[%s2550_s2 + $0xb8] sm:$0xf] %vm1444_vm2, %v1362_v47  ;;  %vm1010_vm14 = vcmp.ge.f32.partialorder %v807_v48, 0.0  ;;  %v1138_v50 = vmul.f32 0.2, %v807_v48  ;;  %vm1042_vm15 = vcmp.ge.f32.partialorder %v887_v49, 0.0  ;;  %v649_v51 = vpop.f32.mrf.mxu0  ;;  %v729_v52 = vpop.f32.mrf.mxu1 }
 0x11b   :  { %v1170_v53 = vmul.f32 0.2, %v887_v49  ;;  %vm947_vm0 = vcmp.ge.f32.partialorder %v649_v51, 0.0  ;;  %v1075_v54 = vmul.f32 0.2, %v649_v51  ;;  %vm979_vm1 = vcmp.ge.f32.partialorder %v729_v52, 0.0 }
 0x11c   :  { %v1266_v55 = vsel %vm1010_vm14, %v807_v48, %v1138_v50  ;;  %v1107_v56 = vmul.f32 0.2, %v729_v52 }
 0x11d   :  { %v1394_v57 = vpack.c.bf16 %v1266_v55, %v1266_v55  ;;  %v1298_v58 = vsel %vm1042_vm15, %v887_v49, %v1170_v53  ;;  %v1203_v59 = vsel %vm947_vm0, %v649_v51, %v1075_v54 }
 0x11e   :  { %v1426_v60 = vpack.c.bf16 %v1298_v58, %v1298_v58  ;;  %v1331_v61 = vpack.c.bf16 %v1203_v59, %v1203_v59  ;;  %v1235_v62 = vsel %vm979_vm1, %v729_v52, %v1107_v56 }
 0x11f   :  { %1523 = vst.msk [vmem:[%s2550_s2 + $0x138] sm:$0xf] %vm1444_vm2, %v1394_v57  ;;  %v1363_v63 = vpack.c.bf16 %v1235_v62, %v1235_v62 }
 0x120   :  { %1555 = vst.msk [vmem:[%s2550_s2 + $0x1b8] sm:$0xf] %vm1444_vm2, %v1426_v60 }
 0x121   :  { %1460 = vst.msk [vmem:[%s2550_s2 + $0x3c] sm:$0xf] %vm1444_vm2, %v1331_v61  ;;  %v809_v0 = vpop.f32.mrf.mxu2  ;;  %v889_v1 = vpop.f32.mrf.mxu3 }
 0x122   :  { %1492 = vst.msk [vmem:[%s2550_s2 + $0xbc] sm:$0xf] %vm1444_vm2, %v1363_v63  ;;  %vm1011_vm3 = vcmp.ge.f32.partialorder %v809_v0, 0.0  ;;  %v1139_v2 = vmul.f32 0.2, %v809_v0  ;;  %vm1043_vm4 = vcmp.ge.f32.partialorder %v889_v1, 0.0  ;;  %v652_v3 = vpop.f32.mrf.mxu0  ;;  %v732_v4 = vpop.f32.mrf.mxu1 }
 0x123   :  { %v1171_v5 = vmul.f32 0.2, %v889_v1  ;;  %vm948_vm5 = vcmp.ge.f32.partialorder %v652_v3, 0.0  ;;  %v1076_v6 = vmul.f32 0.2, %v652_v3  ;;  %vm980_vm6 = vcmp.ge.f32.partialorder %v732_v4, 0.0 }
 0x124   :  { %v1267_v7 = vsel %vm1011_vm3, %v809_v0, %v1139_v2  ;;  %v1108_v8 = vmul.f32 0.2, %v732_v4 }
 0x125   :  { %v1395_v9 = vpack.c.bf16 %v1267_v7, %v1267_v7  ;;  %v1299_v10 = vsel %vm1043_vm4, %v889_v1, %v1171_v5  ;;  %v1204_v11 = vsel %vm948_vm5, %v652_v3, %v1076_v6 }
 0x126   :  { %v1427_v12 = vpack.c.bf16 %v1299_v10, %v1299_v10  ;;  %v1332_v13 = vpack.c.bf16 %v1204_v11, %v1204_v11  ;;  %v1236_v14 = vsel %vm980_vm6, %v732_v4, %v1108_v8 }
 0x127   :  { %1524 = vst.msk [vmem:[%s2550_s2 + $0x13c] sm:$0xf] %vm1444_vm2, %v1395_v9  ;;  %v1364_v15 = vpack.c.bf16 %v1236_v14, %v1236_v14 }
 0x128   :  { %1556 = vst.msk [vmem:[%s2550_s2 + $0x1bc] sm:$0xf] %vm1444_vm2, %v1427_v12 }
 0x129   :  { %1461 = vst.msk [vmem:[%s2550_s2 + $0x40] sm:$0xf] %vm1444_vm2, %v1332_v13  ;;  %v812_v16 = vpop.f32.mrf.mxu2  ;;  %v892_v17 = vpop.f32.mrf.mxu3 }
 0x12a   :  { %1493 = vst.msk [vmem:[%s2550_s2 + $0xc0] sm:$0xf] %vm1444_vm2, %v1364_v15  ;;  %vm1012_vm7 = vcmp.ge.f32.partialorder %v812_v16, 0.0  ;;  %v1140_v18 = vmul.f32 0.2, %v812_v16  ;;  %vm1044_vm8 = vcmp.ge.f32.partialorder %v892_v17, 0.0  ;;  %v654_v19 = vpop.f32.mrf.mxu0  ;;  %v734_v20 = vpop.f32.mrf.mxu1 }
 0x12b   :  { %v1172_v21 = vmul.f32 0.2, %v892_v17  ;;  %vm949_vm9 = vcmp.ge.f32.partialorder %v654_v19, 0.0  ;;  %v1077_v22 = vmul.f32 0.2, %v654_v19  ;;  %vm981_vm10 = vcmp.ge.f32.partialorder %v734_v20, 0.0 }
 0x12c   :  { %v1268_v23 = vsel %vm1012_vm7, %v812_v16, %v1140_v18  ;;  %v1109_v24 = vmul.f32 0.2, %v734_v20 }
 0x12d   :  { %v1396_v25 = vpack.c.bf16 %v1268_v23, %v1268_v23  ;;  %v1300_v26 = vsel %vm1044_vm8, %v892_v17, %v1172_v21  ;;  %v1205_v27 = vsel %vm949_vm9, %v654_v19, %v1077_v22 }
 0x12e   :  { %v1428_v28 = vpack.c.bf16 %v1300_v26, %v1300_v26  ;;  %v1333_v29 = vpack.c.bf16 %v1205_v27, %v1205_v27  ;;  %v1237_v30 = vsel %vm981_vm10, %v734_v20, %v1109_v24 }
 0x12f   :  { %1525 = vst.msk [vmem:[%s2550_s2 + $0x140] sm:$0xf] %vm1444_vm2, %v1396_v25  ;;  %v1365_v31 = vpack.c.bf16 %v1237_v30, %v1237_v30 }
 0x130   :  { %1557 = vst.msk [vmem:[%s2550_s2 + $0x1c0] sm:$0xf] %vm1444_vm2, %v1428_v28 }
 0x131   :  { %1462 = vst.msk [vmem:[%s2550_s2 + $0x44] sm:$0xf] %vm1444_vm2, %v1333_v29  ;;  %v814_v32 = vpop.f32.mrf.mxu2  ;;  %v894_v33 = vpop.f32.mrf.mxu3 }
 0x132   :  { %1494 = vst.msk [vmem:[%s2550_s2 + $0xc4] sm:$0xf] %vm1444_vm2, %v1365_v31  ;;  %vm1013_vm11 = vcmp.ge.f32.partialorder %v814_v32, 0.0  ;;  %v1141_v34 = vmul.f32 0.2, %v814_v32  ;;  %vm1045_vm12 = vcmp.ge.f32.partialorder %v894_v33, 0.0  ;;  %v657_v35 = vpop.f32.mrf.mxu0  ;;  %v737_v36 = vpop.f32.mrf.mxu1 }
 0x133   :  { %v1173_v37 = vmul.f32 0.2, %v894_v33  ;;  %vm950_vm13 = vcmp.ge.f32.partialorder %v657_v35, 0.0  ;;  %v1078_v38 = vmul.f32 0.2, %v657_v35  ;;  %vm982_vm14 = vcmp.ge.f32.partialorder %v737_v36, 0.0 }
 0x134   :  { %v1269_v39 = vsel %vm1013_vm11, %v814_v32, %v1141_v34  ;;  %v1110_v40 = vmul.f32 0.2, %v737_v36 }
 0x135   :  { %v1397_v41 = vpack.c.bf16 %v1269_v39, %v1269_v39  ;;  %v1301_v42 = vsel %vm1045_vm12, %v894_v33, %v1173_v37  ;;  %v1206_v43 = vsel %vm950_vm13, %v657_v35, %v1078_v38 }
 0x136   :  { %v1429_v44 = vpack.c.bf16 %v1301_v42, %v1301_v42  ;;  %v1334_v45 = vpack.c.bf16 %v1206_v43, %v1206_v43  ;;  %v1238_v46 = vsel %vm982_vm14, %v737_v36, %v1110_v40 }
 0x137   :  { %1526 = vst.msk [vmem:[%s2550_s2 + $0x144] sm:$0xf] %vm1444_vm2, %v1397_v41  ;;  %v1366_v47 = vpack.c.bf16 %v1238_v46, %v1238_v46 }
 0x138   :  { %1558 = vst.msk [vmem:[%s2550_s2 + $0x1c4] sm:$0xf] %vm1444_vm2, %v1429_v44 }
 0x139   :  { %1463 = vst.msk [vmem:[%s2550_s2 + $0x48] sm:$0xf] %vm1444_vm2, %v1334_v45  ;;  %v817_v48 = vpop.f32.mrf.mxu2  ;;  %v897_v49 = vpop.f32.mrf.mxu3 }
 0x13a   :  { %1495 = vst.msk [vmem:[%s2550_s2 + $0xc8] sm:$0xf] %vm1444_vm2, %v1366_v47  ;;  %vm1014_vm15 = vcmp.ge.f32.partialorder %v817_v48, 0.0  ;;  %v1142_v50 = vmul.f32 0.2, %v817_v48  ;;  %vm1046_vm0 = vcmp.ge.f32.partialorder %v897_v49, 0.0  ;;  %v659_v51 = vpop.f32.mrf.mxu0  ;;  %v739_v52 = vpop.f32.mrf.mxu1 }
 0x13b   :  { %v1174_v53 = vmul.f32 0.2, %v897_v49  ;;  %vm951_vm1 = vcmp.ge.f32.partialorder %v659_v51, 0.0  ;;  %v1079_v54 = vmul.f32 0.2, %v659_v51  ;;  %vm983_vm3 = vcmp.ge.f32.partialorder %v739_v52, 0.0 }
 0x13c   :  { %v1270_v55 = vsel %vm1014_vm15, %v817_v48, %v1142_v50  ;;  %v1111_v56 = vmul.f32 0.2, %v739_v52 }
 0x13d   :  { %v1398_v57 = vpack.c.bf16 %v1270_v55, %v1270_v55  ;;  %v1302_v58 = vsel %vm1046_vm0, %v897_v49, %v1174_v53  ;;  %v1207_v59 = vsel %vm951_vm1, %v659_v51, %v1079_v54 }
 0x13e   :  { %v1430_v60 = vpack.c.bf16 %v1302_v58, %v1302_v58  ;;  %v1335_v61 = vpack.c.bf16 %v1207_v59, %v1207_v59  ;;  %v1239_v62 = vsel %vm983_vm3, %v739_v52, %v1111_v56 }
 0x13f   :  { %1527 = vst.msk [vmem:[%s2550_s2 + $0x148] sm:$0xf] %vm1444_vm2, %v1398_v57  ;;  %v1367_v63 = vpack.c.bf16 %v1239_v62, %v1239_v62 }
 0x140   :  { %1559 = vst.msk [vmem:[%s2550_s2 + $0x1c8] sm:$0xf] %vm1444_vm2, %v1430_v60 }
 0x141   :  { %1464 = vst.msk [vmem:[%s2550_s2 + $0x4c] sm:$0xf] %vm1444_vm2, %v1335_v61  ;;  %v819_v0 = vpop.f32.mrf.mxu2  ;;  %v899_v1 = vpop.f32.mrf.mxu3 }
 0x142   :  { %1496 = vst.msk [vmem:[%s2550_s2 + $0xcc] sm:$0xf] %vm1444_vm2, %v1367_v63  ;;  %vm1015_vm4 = vcmp.ge.f32.partialorder %v819_v0, 0.0  ;;  %v1143_v2 = vmul.f32 0.2, %v819_v0  ;;  %vm1047_vm5 = vcmp.ge.f32.partialorder %v899_v1, 0.0  ;;  %v662_v3 = vpop.f32.mrf.mxu0  ;;  %v742_v4 = vpop.f32.mrf.mxu1 }
 0x143   :  { %v1175_v5 = vmul.f32 0.2, %v899_v1  ;;  %vm952_vm6 = vcmp.ge.f32.partialorder %v662_v3, 0.0  ;;  %v1080_v6 = vmul.f32 0.2, %v662_v3  ;;  %vm984_vm7 = vcmp.ge.f32.partialorder %v742_v4, 0.0 }
 0x144   :  { %v1271_v7 = vsel %vm1015_vm4, %v819_v0, %v1143_v2  ;;  %v1112_v8 = vmul.f32 0.2, %v742_v4 }
 0x145   :  { %v1399_v9 = vpack.c.bf16 %v1271_v7, %v1271_v7  ;;  %v1303_v10 = vsel %vm1047_vm5, %v899_v1, %v1175_v5  ;;  %v1208_v11 = vsel %vm952_vm6, %v662_v3, %v1080_v6 }
 0x146   :  { %v1431_v12 = vpack.c.bf16 %v1303_v10, %v1303_v10  ;;  %v1336_v13 = vpack.c.bf16 %v1208_v11, %v1208_v11  ;;  %v1240_v14 = vsel %vm984_vm7, %v742_v4, %v1112_v8 }
 0x147   :  { %1528 = vst.msk [vmem:[%s2550_s2 + $0x14c] sm:$0xf] %vm1444_vm2, %v1399_v9  ;;  %v1368_v15 = vpack.c.bf16 %v1240_v14, %v1240_v14 }
 0x148   :  { %1560 = vst.msk [vmem:[%s2550_s2 + $0x1cc] sm:$0xf] %vm1444_vm2, %v1431_v12 }
 0x149   :  { %1465 = vst.msk [vmem:[%s2550_s2 + $0x50] sm:$0xf] %vm1444_vm2, %v1336_v13  ;;  %v822_v16 = vpop.f32.mrf.mxu2  ;;  %v902_v17 = vpop.f32.mrf.mxu3 }
 0x14a   :  { %1497 = vst.msk [vmem:[%s2550_s2 + $0xd0] sm:$0xf] %vm1444_vm2, %v1368_v15  ;;  %vm1016_vm8 = vcmp.ge.f32.partialorder %v822_v16, 0.0  ;;  %v1144_v18 = vmul.f32 0.2, %v822_v16  ;;  %vm1048_vm9 = vcmp.ge.f32.partialorder %v902_v17, 0.0  ;;  %v664_v19 = vpop.f32.mrf.mxu0  ;;  %v744_v20 = vpop.f32.mrf.mxu1 }
 0x14b   :  { %v1176_v21 = vmul.f32 0.2, %v902_v17  ;;  %vm953_vm10 = vcmp.ge.f32.partialorder %v664_v19, 0.0  ;;  %v1081_v22 = vmul.f32 0.2, %v664_v19  ;;  %vm985_vm11 = vcmp.ge.f32.partialorder %v744_v20, 0.0 }
 0x14c   :  { %v1272_v23 = vsel %vm1016_vm8, %v822_v16, %v1144_v18  ;;  %v1113_v24 = vmul.f32 0.2, %v744_v20 }
 0x14d   :  { %v1400_v25 = vpack.c.bf16 %v1272_v23, %v1272_v23  ;;  %v1304_v26 = vsel %vm1048_vm9, %v902_v17, %v1176_v21  ;;  %v1209_v27 = vsel %vm953_vm10, %v664_v19, %v1081_v22 }
 0x14e   :  { %v1432_v28 = vpack.c.bf16 %v1304_v26, %v1304_v26  ;;  %v1337_v29 = vpack.c.bf16 %v1209_v27, %v1209_v27  ;;  %v1241_v30 = vsel %vm985_vm11, %v744_v20, %v1113_v24 }
 0x14f   :  { %1529 = vst.msk [vmem:[%s2550_s2 + $0x150] sm:$0xf] %vm1444_vm2, %v1400_v25  ;;  %v1369_v31 = vpack.c.bf16 %v1241_v30, %v1241_v30 }
 0x150   :  { %1561 = vst.msk [vmem:[%s2550_s2 + $0x1d0] sm:$0xf] %vm1444_vm2, %v1432_v28 }
 0x151   :  { %1466 = vst.msk [vmem:[%s2550_s2 + $0x54] sm:$0xf] %vm1444_vm2, %v1337_v29  ;;  %v824_v32 = vpop.f32.mrf.mxu2  ;;  %v904_v33 = vpop.f32.mrf.mxu3 }
 0x152   :  { %1498 = vst.msk [vmem:[%s2550_s2 + $0xd4] sm:$0xf] %vm1444_vm2, %v1369_v31  ;;  %vm1017_vm12 = vcmp.ge.f32.partialorder %v824_v32, 0.0  ;;  %v1145_v34 = vmul.f32 0.2, %v824_v32  ;;  %vm1049_vm13 = vcmp.ge.f32.partialorder %v904_v33, 0.0  ;;  %v667_v35 = vpop.f32.mrf.mxu0  ;;  %v747_v36 = vpop.f32.mrf.mxu1 }
 0x153   :  { %v1177_v37 = vmul.f32 0.2, %v904_v33  ;;  %vm954_vm14 = vcmp.ge.f32.partialorder %v667_v35, 0.0  ;;  %v1082_v38 = vmul.f32 0.2, %v667_v35  ;;  %vm986_vm15 = vcmp.ge.f32.partialorder %v747_v36, 0.0 }
 0x154   :  { %v1273_v39 = vsel %vm1017_vm12, %v824_v32, %v1145_v34  ;;  %v1114_v40 = vmul.f32 0.2, %v747_v36 }
 0x155   :  { %v1401_v41 = vpack.c.bf16 %v1273_v39, %v1273_v39  ;;  %v1305_v42 = vsel %vm1049_vm13, %v904_v33, %v1177_v37  ;;  %v1210_v43 = vsel %vm954_vm14, %v667_v35, %v1082_v38 }
 0x156   :  { %v1433_v44 = vpack.c.bf16 %v1305_v42, %v1305_v42  ;;  %v1338_v45 = vpack.c.bf16 %v1210_v43, %v1210_v43  ;;  %v1242_v46 = vsel %vm986_vm15, %v747_v36, %v1114_v40 }
 0x157   :  { %1530 = vst.msk [vmem:[%s2550_s2 + $0x154] sm:$0xf] %vm1444_vm2, %v1401_v41  ;;  %v1370_v47 = vpack.c.bf16 %v1242_v46, %v1242_v46 }
 0x158   :  { %1562 = vst.msk [vmem:[%s2550_s2 + $0x1d4] sm:$0xf] %vm1444_vm2, %v1433_v44 }
 0x159   :  { %1467 = vst.msk [vmem:[%s2550_s2 + $0x58] sm:$0xf] %vm1444_vm2, %v1338_v45  ;;  %v827_v48 = vpop.f32.mrf.mxu2  ;;  %v907_v49 = vpop.f32.mrf.mxu3 }
 0x15a   :  { %1499 = vst.msk [vmem:[%s2550_s2 + $0xd8] sm:$0xf] %vm1444_vm2, %v1370_v47  ;;  %vm1018_vm0 = vcmp.ge.f32.partialorder %v827_v48, 0.0  ;;  %v1146_v50 = vmul.f32 0.2, %v827_v48  ;;  %vm1050_vm1 = vcmp.ge.f32.partialorder %v907_v49, 0.0  ;;  %v669_v51 = vpop.f32.mrf.mxu0  ;;  %v749_v52 = vpop.f32.mrf.mxu1 }
 0x15b   :  { %v1178_v53 = vmul.f32 0.2, %v907_v49  ;;  %vm955_vm3 = vcmp.ge.f32.partialorder %v669_v51, 0.0  ;;  %v1083_v54 = vmul.f32 0.2, %v669_v51  ;;  %vm987_vm4 = vcmp.ge.f32.partialorder %v749_v52, 0.0 }
 0x15c   :  { %v1274_v55 = vsel %vm1018_vm0, %v827_v48, %v1146_v50  ;;  %v1115_v56 = vmul.f32 0.2, %v749_v52 }
 0x15d   :  { %v1402_v57 = vpack.c.bf16 %v1274_v55, %v1274_v55  ;;  %v1306_v58 = vsel %vm1050_vm1, %v907_v49, %v1178_v53  ;;  %v1211_v59 = vsel %vm955_vm3, %v669_v51, %v1083_v54 }
 0x15e   :  { %v1434_v60 = vpack.c.bf16 %v1306_v58, %v1306_v58  ;;  %v1339_v61 = vpack.c.bf16 %v1211_v59, %v1211_v59  ;;  %v1243_v62 = vsel %vm987_vm4, %v749_v52, %v1115_v56 }
 0x15f   :  { %1531 = vst.msk [vmem:[%s2550_s2 + $0x158] sm:$0xf] %vm1444_vm2, %v1402_v57  ;;  %v1371_v63 = vpack.c.bf16 %v1243_v62, %v1243_v62 }
 0x160   :  { %1563 = vst.msk [vmem:[%s2550_s2 + $0x1d8] sm:$0xf] %vm1444_vm2, %v1434_v60 }
 0x161   :  { %1468 = vst.msk [vmem:[%s2550_s2 + $0x5c] sm:$0xf] %vm1444_vm2, %v1339_v61  ;;  %v829_v0 = vpop.f32.mrf.mxu2  ;;  %v909_v1 = vpop.f32.mrf.mxu3 }
 0x162   :  { %1500 = vst.msk [vmem:[%s2550_s2 + $0xdc] sm:$0xf] %vm1444_vm2, %v1371_v63  ;;  %vm1019_vm5 = vcmp.ge.f32.partialorder %v829_v0, 0.0  ;;  %v1147_v2 = vmul.f32 0.2, %v829_v0  ;;  %vm1051_vm6 = vcmp.ge.f32.partialorder %v909_v1, 0.0  ;;  %v672_v3 = vpop.f32.mrf.mxu0  ;;  %v752_v4 = vpop.f32.mrf.mxu1 }
 0x163   :  { %v1179_v5 = vmul.f32 0.2, %v909_v1  ;;  %vm956_vm7 = vcmp.ge.f32.partialorder %v672_v3, 0.0  ;;  %v1084_v6 = vmul.f32 0.2, %v672_v3  ;;  %vm988_vm8 = vcmp.ge.f32.partialorder %v752_v4, 0.0 }
 0x164   :  { %v1275_v7 = vsel %vm1019_vm5, %v829_v0, %v1147_v2  ;;  %v1116_v8 = vmul.f32 0.2, %v752_v4 }
 0x165   :  { %v1403_v9 = vpack.c.bf16 %v1275_v7, %v1275_v7  ;;  %v1307_v10 = vsel %vm1051_vm6, %v909_v1, %v1179_v5  ;;  %v1212_v11 = vsel %vm956_vm7, %v672_v3, %v1084_v6 }
 0x166   :  { %v1435_v12 = vpack.c.bf16 %v1307_v10, %v1307_v10  ;;  %v1340_v13 = vpack.c.bf16 %v1212_v11, %v1212_v11  ;;  %v1244_v14 = vsel %vm988_vm8, %v752_v4, %v1116_v8 }
 0x167   :  { %1532 = vst.msk [vmem:[%s2550_s2 + $0x15c] sm:$0xf] %vm1444_vm2, %v1403_v9  ;;  %v1372_v15 = vpack.c.bf16 %v1244_v14, %v1244_v14 }
 0x168   :  { %1564 = vst.msk [vmem:[%s2550_s2 + $0x1dc] sm:$0xf] %vm1444_vm2, %v1435_v12 }
 0x169   :  { %1469 = vst.msk [vmem:[%s2550_s2 + $0x60] sm:$0xf] %vm1444_vm2, %v1340_v13  ;;  %v832_v16 = vpop.f32.mrf.mxu2  ;;  %v912_v17 = vpop.f32.mrf.mxu3 }
 0x16a   :  { %1501 = vst.msk [vmem:[%s2550_s2 + $0xe0] sm:$0xf] %vm1444_vm2, %v1372_v15  ;;  %vm1020_vm9 = vcmp.ge.f32.partialorder %v832_v16, 0.0  ;;  %v1148_v18 = vmul.f32 0.2, %v832_v16  ;;  %vm1052_vm10 = vcmp.ge.f32.partialorder %v912_v17, 0.0  ;;  %v674_v19 = vpop.f32.mrf.mxu0  ;;  %v754_v20 = vpop.f32.mrf.mxu1 }
 0x16b   :  { %v1180_v21 = vmul.f32 0.2, %v912_v17  ;;  %vm957_vm11 = vcmp.ge.f32.partialorder %v674_v19, 0.0  ;;  %v1085_v22 = vmul.f32 0.2, %v674_v19  ;;  %vm989_vm12 = vcmp.ge.f32.partialorder %v754_v20, 0.0 }
 0x16c   :  { %v1276_v23 = vsel %vm1020_vm9, %v832_v16, %v1148_v18  ;;  %v1117_v24 = vmul.f32 0.2, %v754_v20 }
 0x16d   :  { %v1404_v25 = vpack.c.bf16 %v1276_v23, %v1276_v23  ;;  %v1308_v26 = vsel %vm1052_vm10, %v912_v17, %v1180_v21  ;;  %v1213_v27 = vsel %vm957_vm11, %v674_v19, %v1085_v22 }
 0x16e   :  { %v1436_v28 = vpack.c.bf16 %v1308_v26, %v1308_v26  ;;  %v1341_v29 = vpack.c.bf16 %v1213_v27, %v1213_v27  ;;  %v1245_v30 = vsel %vm989_vm12, %v754_v20, %v1117_v24 }
 0x16f   :  { %1533 = vst.msk [vmem:[%s2550_s2 + $0x160] sm:$0xf] %vm1444_vm2, %v1404_v25  ;;  %v1373_v31 = vpack.c.bf16 %v1245_v30, %v1245_v30 }
 0x170   :  { %1565 = vst.msk [vmem:[%s2550_s2 + $0x1e0] sm:$0xf] %vm1444_vm2, %v1436_v28 }
 0x171   :  { %1470 = vst.msk [vmem:[%s2550_s2 + $0x64] sm:$0xf] %vm1444_vm2, %v1341_v29  ;;  %v834_v32 = vpop.f32.mrf.mxu2  ;;  %v914_v33 = vpop.f32.mrf.mxu3 }
 0x172   :  { %1502 = vst.msk [vmem:[%s2550_s2 + $0xe4] sm:$0xf] %vm1444_vm2, %v1373_v31  ;;  %vm1021_vm13 = vcmp.ge.f32.partialorder %v834_v32, 0.0  ;;  %v1149_v34 = vmul.f32 0.2, %v834_v32  ;;  %vm1053_vm14 = vcmp.ge.f32.partialorder %v914_v33, 0.0  ;;  %v677_v35 = vpop.f32.mrf.mxu0  ;;  %v757_v36 = vpop.f32.mrf.mxu1 }
 0x173   :  { %v1181_v37 = vmul.f32 0.2, %v914_v33  ;;  %vm958_vm15 = vcmp.ge.f32.partialorder %v677_v35, 0.0  ;;  %v1086_v38 = vmul.f32 0.2, %v677_v35  ;;  %vm990_vm0 = vcmp.ge.f32.partialorder %v757_v36, 0.0 }
 0x174   :  { %v1277_v39 = vsel %vm1021_vm13, %v834_v32, %v1149_v34  ;;  %v1118_v40 = vmul.f32 0.2, %v757_v36 }
 0x175   :  { %v1405_v41 = vpack.c.bf16 %v1277_v39, %v1277_v39  ;;  %v1309_v42 = vsel %vm1053_vm14, %v914_v33, %v1181_v37  ;;  %v1214_v43 = vsel %vm958_vm15, %v677_v35, %v1086_v38 }
 0x176   :  { %v1437_v44 = vpack.c.bf16 %v1309_v42, %v1309_v42  ;;  %v1342_v45 = vpack.c.bf16 %v1214_v43, %v1214_v43  ;;  %v1246_v46 = vsel %vm990_vm0, %v757_v36, %v1118_v40 }
 0x177   :  { %1534 = vst.msk [vmem:[%s2550_s2 + $0x164] sm:$0xf] %vm1444_vm2, %v1405_v41  ;;  %v1374_v47 = vpack.c.bf16 %v1246_v46, %v1246_v46 }
 0x178   :  { %1566 = vst.msk [vmem:[%s2550_s2 + $0x1e4] sm:$0xf] %vm1444_vm2, %v1437_v44 }
 0x179   :  { %1471 = vst.msk [vmem:[%s2550_s2 + $0x68] sm:$0xf] %vm1444_vm2, %v1342_v45  ;;  %v837_v48 = vpop.f32.mrf.mxu2  ;;  %v917_v49 = vpop.f32.mrf.mxu3 }
 0x17a   :  { %1503 = vst.msk [vmem:[%s2550_s2 + $0xe8] sm:$0xf] %vm1444_vm2, %v1374_v47  ;;  %vm1022_vm1 = vcmp.ge.f32.partialorder %v837_v48, 0.0  ;;  %v1150_v50 = vmul.f32 0.2, %v837_v48  ;;  %vm1054_vm3 = vcmp.ge.f32.partialorder %v917_v49, 0.0  ;;  %v679_v51 = vpop.f32.mrf.mxu0  ;;  %v759_v52 = vpop.f32.mrf.mxu1 }
 0x17b   :  { %v1182_v53 = vmul.f32 0.2, %v917_v49  ;;  %vm959_vm4 = vcmp.ge.f32.partialorder %v679_v51, 0.0  ;;  %v1087_v54 = vmul.f32 0.2, %v679_v51  ;;  %vm991_vm5 = vcmp.ge.f32.partialorder %v759_v52, 0.0 }
 0x17c   :  { %v1278_v55 = vsel %vm1022_vm1, %v837_v48, %v1150_v50  ;;  %v1119_v56 = vmul.f32 0.2, %v759_v52 }
 0x17d   :  { %v1406_v57 = vpack.c.bf16 %v1278_v55, %v1278_v55  ;;  %v1310_v58 = vsel %vm1054_vm3, %v917_v49, %v1182_v53  ;;  %v1215_v59 = vsel %vm959_vm4, %v679_v51, %v1087_v54 }
 0x17e   :  { %v1438_v60 = vpack.c.bf16 %v1310_v58, %v1310_v58  ;;  %v1343_v61 = vpack.c.bf16 %v1215_v59, %v1215_v59  ;;  %v1247_v62 = vsel %vm991_vm5, %v759_v52, %v1119_v56 }
 0x17f   :  { %1535 = vst.msk [vmem:[%s2550_s2 + $0x168] sm:$0xf] %vm1444_vm2, %v1406_v57  ;;  %v1375_v63 = vpack.c.bf16 %v1247_v62, %v1247_v62 }
 0x180   :  { %1567 = vst.msk [vmem:[%s2550_s2 + $0x1e8] sm:$0xf] %vm1444_vm2, %v1438_v60 }
 0x181   :  { %1472 = vst.msk [vmem:[%s2550_s2 + $0x6c] sm:$0xf] %vm1444_vm2, %v1343_v61  ;;  %v839_v0 = vpop.f32.mrf.mxu2  ;;  %v919_v1 = vpop.f32.mrf.mxu3 }
 0x182   :  { %1504 = vst.msk [vmem:[%s2550_s2 + $0xec] sm:$0xf] %vm1444_vm2, %v1375_v63  ;;  %vm1023_vm6 = vcmp.ge.f32.partialorder %v839_v0, 0.0  ;;  %v1151_v2 = vmul.f32 0.2, %v839_v0  ;;  %vm1055_vm7 = vcmp.ge.f32.partialorder %v919_v1, 0.0  ;;  %v682_v3 = vpop.f32.mrf.mxu0  ;;  %v762_v4 = vpop.f32.mrf.mxu1 }
 0x183   :  { %v1183_v5 = vmul.f32 0.2, %v919_v1  ;;  %vm960_vm8 = vcmp.ge.f32.partialorder %v682_v3, 0.0  ;;  %v1088_v6 = vmul.f32 0.2, %v682_v3  ;;  %vm992_vm9 = vcmp.ge.f32.partialorder %v762_v4, 0.0 }
 0x184   :  { %v1279_v7 = vsel %vm1023_vm6, %v839_v0, %v1151_v2  ;;  %v1120_v8 = vmul.f32 0.2, %v762_v4 }
 0x185   :  { %v1407_v9 = vpack.c.bf16 %v1279_v7, %v1279_v7  ;;  %v1311_v10 = vsel %vm1055_vm7, %v919_v1, %v1183_v5  ;;  %v1216_v11 = vsel %vm960_vm8, %v682_v3, %v1088_v6 }
 0x186   :  { %v1439_v12 = vpack.c.bf16 %v1311_v10, %v1311_v10  ;;  %v1344_v13 = vpack.c.bf16 %v1216_v11, %v1216_v11  ;;  %v1248_v14 = vsel %vm992_vm9, %v762_v4, %v1120_v8 }
 0x187   :  { %1536 = vst.msk [vmem:[%s2550_s2 + $0x16c] sm:$0xf] %vm1444_vm2, %v1407_v9  ;;  %v1376_v15 = vpack.c.bf16 %v1248_v14, %v1248_v14 }
 0x188   :  { %1568 = vst.msk [vmem:[%s2550_s2 + $0x1ec] sm:$0xf] %vm1444_vm2, %v1439_v12 }
 0x189   :  { %1473 = vst.msk [vmem:[%s2550_s2 + $0x70] sm:$0xf] %vm1444_vm2, %v1344_v13  ;;  %v842_v16 = vpop.f32.mrf.mxu2  ;;  %v922_v17 = vpop.f32.mrf.mxu3 }
 0x18a   :  { %1505 = vst.msk [vmem:[%s2550_s2 + $0xf0] sm:$0xf] %vm1444_vm2, %v1376_v15  ;;  %vm1024_vm10 = vcmp.ge.f32.partialorder %v842_v16, 0.0  ;;  %v1152_v18 = vmul.f32 0.2, %v842_v16  ;;  %vm1056_vm11 = vcmp.ge.f32.partialorder %v922_v17, 0.0  ;;  %v684_v19 = vpop.f32.mrf.mxu0  ;;  %v764_v20 = vpop.f32.mrf.mxu1 }
 0x18b   :  { %v1184_v21 = vmul.f32 0.2, %v922_v17  ;;  %vm961_vm12 = vcmp.ge.f32.partialorder %v684_v19, 0.0  ;;  %v1089_v22 = vmul.f32 0.2, %v684_v19  ;;  %vm993_vm13 = vcmp.ge.f32.partialorder %v764_v20, 0.0 }
 0x18c   :  { %v1280_v23 = vsel %vm1024_vm10, %v842_v16, %v1152_v18  ;;  %v1121_v24 = vmul.f32 0.2, %v764_v20 }
 0x18d   :  { %v1408_v25 = vpack.c.bf16 %v1280_v23, %v1280_v23  ;;  %v1312_v26 = vsel %vm1056_vm11, %v922_v17, %v1184_v21  ;;  %v1217_v27 = vsel %vm961_vm12, %v684_v19, %v1089_v22 }
 0x18e   :  { %v1440_v28 = vpack.c.bf16 %v1312_v26, %v1312_v26  ;;  %v1345_v29 = vpack.c.bf16 %v1217_v27, %v1217_v27  ;;  %v1249_v30 = vsel %vm993_vm13, %v764_v20, %v1121_v24 }
 0x18f   :  { %1537 = vst.msk [vmem:[%s2550_s2 + $0x170] sm:$0xf] %vm1444_vm2, %v1408_v25  ;;  %v1377_v31 = vpack.c.bf16 %v1249_v30, %v1249_v30 }
 0x190   :  { %1569 = vst.msk [vmem:[%s2550_s2 + $0x1f0] sm:$0xf] %vm1444_vm2, %v1440_v28 }
 0x191   :  { %1474 = vst.msk [vmem:[%s2550_s2 + $0x74] sm:$0xf] %vm1444_vm2, %v1345_v29  ;;  %v844_v32 = vpop.f32.mrf.mxu2  ;;  %v924_v33 = vpop.f32.mrf.mxu3 }
 0x192   :  { %1506 = vst.msk [vmem:[%s2550_s2 + $0xf4] sm:$0xf] %vm1444_vm2, %v1377_v31  ;;  %vm1025_vm14 = vcmp.ge.f32.partialorder %v844_v32, 0.0  ;;  %v1153_v34 = vmul.f32 0.2, %v844_v32  ;;  %vm1057_vm15 = vcmp.ge.f32.partialorder %v924_v33, 0.0  ;;  %v687_v35 = vpop.f32.mrf.mxu0  ;;  %v767_v36 = vpop.f32.mrf.mxu1 }
 0x193   :  { %v1185_v37 = vmul.f32 0.2, %v924_v33  ;;  %vm962_vm0 = vcmp.ge.f32.partialorder %v687_v35, 0.0  ;;  %v1090_v38 = vmul.f32 0.2, %v687_v35  ;;  %vm994_vm1 = vcmp.ge.f32.partialorder %v767_v36, 0.0 }
 0x194   :  { %v1281_v39 = vsel %vm1025_vm14, %v844_v32, %v1153_v34  ;;  %v1122_v40 = vmul.f32 0.2, %v767_v36 }
 0x195   :  { %v1409_v41 = vpack.c.bf16 %v1281_v39, %v1281_v39  ;;  %v1313_v42 = vsel %vm1057_vm15, %v924_v33, %v1185_v37  ;;  %v1218_v43 = vsel %vm962_vm0, %v687_v35, %v1090_v38 }
 0x196   :  { %v1441_v44 = vpack.c.bf16 %v1313_v42, %v1313_v42  ;;  %v1346_v45 = vpack.c.bf16 %v1218_v43, %v1218_v43  ;;  %v1250_v46 = vsel %vm994_vm1, %v767_v36, %v1122_v40 }
 0x197   :  { %1538 = vst.msk [vmem:[%s2550_s2 + $0x174] sm:$0xf] %vm1444_vm2, %v1409_v41  ;;  %v1378_v47 = vpack.c.bf16 %v1250_v46, %v1250_v46 }
 0x198   :  { %1570 = vst.msk [vmem:[%s2550_s2 + $0x1f4] sm:$0xf] %vm1444_vm2, %v1441_v44 }
 0x199   :  { %1475 = vst.msk [vmem:[%s2550_s2 + $0x78] sm:$0xf] %vm1444_vm2, %v1346_v45  ;;  %v847_v48 = vpop.f32.mrf.mxu2  ;;  %v927_v49 = vpop.f32.mrf.mxu3 }
 0x19a   :  { %1507 = vst.msk [vmem:[%s2550_s2 + $0xf8] sm:$0xf] %vm1444_vm2, %v1378_v47  ;;  %vm1026_vm3 = vcmp.ge.f32.partialorder %v847_v48, 0.0  ;;  %v1154_v50 = vmul.f32 0.2, %v847_v48  ;;  %vm1058_vm4 = vcmp.ge.f32.partialorder %v927_v49, 0.0  ;;  %v689_v51 = vpop.f32.mrf.mxu0  ;;  %v769_v52 = vpop.f32.mrf.mxu1 }
 0x19b   :  { %v1186_v53 = vmul.f32 0.2, %v927_v49  ;;  %vm963_vm5 = vcmp.ge.f32.partialorder %v689_v51, 0.0  ;;  %v1091_v54 = vmul.f32 0.2, %v689_v51  ;;  %vm995_vm6 = vcmp.ge.f32.partialorder %v769_v52, 0.0 }
 0x19c   :  { %v1282_v55 = vsel %vm1026_vm3, %v847_v48, %v1154_v50  ;;  %v1123_v56 = vmul.f32 0.2, %v769_v52 }
 0x19d   :  { %v1410_v57 = vpack.c.bf16 %v1282_v55, %v1282_v55  ;;  %v1314_v58 = vsel %vm1058_vm4, %v927_v49, %v1186_v53  ;;  %v1219_v59 = vsel %vm963_vm5, %v689_v51, %v1091_v54 }
 0x19e   :  { %v1442_v60 = vpack.c.bf16 %v1314_v58, %v1314_v58  ;;  %v1347_v61 = vpack.c.bf16 %v1219_v59, %v1219_v59  ;;  %v1251_v62 = vsel %vm995_vm6, %v769_v52, %v1123_v56 }
 0x19f   :  { %1539 = vst.msk [vmem:[%s2550_s2 + $0x178] sm:$0xf] %vm1444_vm2, %v1410_v57  ;;  %v1379_v63 = vpack.c.bf16 %v1251_v62, %v1251_v62 }
 0x1a0   :  { %1571 = vst.msk [vmem:[%s2550_s2 + $0x1f8] sm:$0xf] %vm1444_vm2, %v1442_v60 }
 0x1a1   :  { %1476 = vst.msk [vmem:[%s2550_s2 + $0x7c] sm:$0xf] %vm1444_vm2, %v1347_v61  ;;  %v849_v0 = vpop.f32.mrf.mxu2  ;;  %v929_v1 = vpop.f32.mrf.mxu3 }
 0x1a2   :  { %1508 = vst.msk [vmem:[%s2550_s2 + $0xfc] sm:$0xf] %vm1444_vm2, %v1379_v63  ;;  %vm1027_vm7 = vcmp.ge.f32.partialorder %v849_v0, 0.0  ;;  %v1155_v2 = vmul.f32 0.2, %v849_v0  ;;  %vm1059_vm8 = vcmp.ge.f32.partialorder %v929_v1, 0.0 }
 0x1a3   :  { %v1187_v3 = vmul.f32 0.2, %v929_v1 }
 0x1a4   :  { %v1283_v4 = vsel %vm1027_vm7, %v849_v0, %v1155_v2 }
 0x1a5   :  { %v1411_v5 = vpack.c.bf16 %v1283_v4, %v1283_v4  ;;  %v1315_v6 = vsel %vm1059_vm8, %v929_v1, %v1187_v3 }
 0x1a6   :  { %v1443_v7 = vpack.c.bf16 %v1315_v6, %v1315_v6 }
 0x1a7   :  { %1540 = vst.msk [vmem:[%s2550_s2 + $0x17c] sm:$0xf] %vm1444_vm2, %v1411_v5 }
 0x1a8   :  { %1572 = vst.msk [vmem:[%s2550_s2 + $0x1fc] sm:$0xf] %vm1444_vm2, %v1443_v7 }
 0x1a9   :  { %1577 = vsyncpa [#allocation3], 1 }

</bundles_post_ra>
